<compile_context>
chip_gen: v5e
topology: v5e:2x2
jax: 0.10.0
libtpu: 0.0.40
codegen_flags: <defaults>
</compile_context>

<pallas_src>
import jax
import jax.numpy as jnp
from jax import lax
from jax.experimental import pallas as pl
from jax.experimental.pallas import tpu as pltpu  # noqa: F401  (TPU backend)


def lstm_fc_kernel(x_ref, wih_ref, bias_ref, wbig_ref, wfc_ref, bfc_ref, out_ref):
    """One invocation: hoisted input projection + wavefront-fused recurrence + FC head.

    Every 8H-wide gate pre-activation uses the interleaved layout
    [i1,i2 | f1,f2 | o1,o2 | g1,g2] (H lanes per block).
    """
    TB, _ = x_ref.shape                        # TB = (T + 1) * Bp  (one trailing zero step)
    Bp = out_ref.shape[0]
    T1 = TB // Bp                              # T + 1 wavefront steps
    H = wbig_ref.shape[0] // 2

    # ---- hoisted layer-1 input projection for ALL timesteps: one bf16 MXU pass, f32 accum.
    # Layer-2 slots of wih_ref are zero columns, so after the bias add they hold exactly b2
    # (the time-independent part of layer-2's pre-activation used by the wavefront).
    xpb = (jnp.dot(x_ref[...], wih_ref[...], preferred_element_type=jnp.float32)
           + bias_ref[...])                    # ((T+1)*Bp, 8H) f32 value — no VMEM round-trip

    wbig = wbig_ref[...]                       # (2H, 8H) bf16: [[W_hh1 | W_ih2], [0 | W_hh2]]

    # lane mask selecting the layer-1 half of a (Bp, 2H) tensor (used only at step 0)
    l1_mask = (lax.broadcasted_iota(jnp.int32, (1, 2 * H), 1) < H).astype(jnp.float32)

    hc = jnp.zeros((Bp, 2 * H), jnp.float32)   # [h1 | h2]
    cc = jnp.zeros((Bp, 2 * H), jnp.float32)   # [c1 | c2]

    # Wavefront recurrence, fully unrolled at trace time (T is small here).
    # Step s: layer-1 at t=s and layer-2 at t=s-1 -> ONE fused matmul per serial step.
    for s in range(T1):
        pre = xpb[s * Bp:(s + 1) * Bp, :]      # static, sublane-aligned slice of the value
        if s > 0:                              # at s == 0, hc == 0 so the dot would be zero
            pre = pre + jnp.dot(hc.astype(jnp.bfloat16), wbig,
                                preferred_element_type=jnp.float32)
        sig = jax.nn.sigmoid(pre[:, :6 * H])   # [i1,i2 | f1,f2 | o1,o2]
        g = jnp.tanh(pre[:, 6 * H:])           # [g1,g2]
        i_all = sig[:, :2 * H]
        if s == 0:
            i_all = i_all * l1_mask            # suppress layer-2's phantom t = -1 update
        cc = sig[:, 2 * H:4 * H] * cc + i_all * g
        hc = sig[:, 4 * H:6 * H] * jnp.tanh(cc)
        # At s == T1-1 the layer-1 half is a harmless dummy step (zero-padded input);
        # only the layer-2 half (h2 at t = T-1) is consumed below.

    h2_last = hc[:, H:2 * H]                   # layer-2 hidden state at the last timestep
    out_ref[...] = (jnp.dot(h2_last.astype(jnp.bfloat16), wfc_ref[...],
                            preferred_element_type=jnp.float32)
                    + bfc_ref[...]).astype(out_ref.dtype)


def pose_estimation_lstm_forward(x, kparams):
    """x: (B, T, input_size) float32.  Returns (B, output_size) float32."""
    B, T, D = x.shape
    H, O = kparams["wfc_t"].shape
    Bp = max(8, ((B + 7) // 8) * 8)            # pad batch to the sublane width

    # time-major, batch-padded, plus one trailing all-zero timestep (drives the wavefront
    # epilogue where only layer-2 does real work); pre-flattened so the kernel never reshapes.
    x_p = jnp.zeros((T + 1, Bp, D), jnp.float32)
    x_p = x_p.at[:T, :B, :].set(jnp.transpose(x, (1, 0, 2)))
    x_flat = x_p.reshape((T + 1) * Bp, D).astype(jnp.bfloat16)

    out = pl.pallas_call(
        lstm_fc_kernel,
        out_shape=jax.ShapeDtypeStruct((Bp, O), jnp.float32),
    )(x_flat, kparams["wih1_8"], kparams["bias8"], kparams["wbig"],
      kparams["wfc_t"], kparams["bfc"])
    return out[:B]


# ---------------------------------------------------------------------------
# Parameter handling: PyTorch-layout params -> fused kernel layout
# ---------------------------------------------------------------------------

def init_torch_like_params(key, D, H, O):
    """PyTorch-shaped LSTM/Linear params with U(-1/sqrt(H), 1/sqrt(H)) init."""
    k = 1.0 / jnp.sqrt(jnp.float32(H))
    ks = jax.random.split(key, 10)
    u = lambda kk, shape: jax.random.uniform(kk, shape, jnp.float32, -k, k)
    return {
        "w_ih_l0": u(ks[0], (4 * H, D)),
        "w_hh_l0": u(ks[1], (4 * H, H)),
        "b_ih_l0": u(ks[2], (4 * H,)),
        "b_hh_l0": u(ks[3], (4 * H,)),
        "w_ih_l1": u(ks[4], (4 * H, H)),
        "w_hh_l1": u(ks[5], (4 * H, H)),
        "b_ih_l1": u(ks[6], (4 * H,)),
        "b_hh_l1": u(ks[7], (4 * H,)),
        "fc_w":    u(ks[8], (O, H)),
        "fc_b":    u(ks[9], (O,)),
    }


def _place(m4, layer, H):
    """Scatter a (X, 4H) matrix whose column blocks follow PyTorch's [i, f, g, o] order into
    an (X, 8H) matrix with the fused interleaved layout [i1,i2 | f1,f2 | o1,o2 | g1,g2],
    filling only this layer's slots (layer in {0, 1}); other slots stay zero."""
    X = m4.shape[0]
    out = jnp.zeros((X, 8 * H), m4.dtype)
    for tgt, src in enumerate((0, 1, 3, 2)):            # target gate groups: i, f, o, g
        col = (2 * tgt + layer) * H
        out = out.at[:, col:col + H].set(m4[:, src * H:(src + 1) * H])
    return out


def prepare_kernel_params(p):
    """PyTorch layout -> fused/interleaved gate columns, pre-summed biases, bf16 MXU operands."""
    H = p["w_hh_l0"].shape[1]
    # input projection weight: layer-1 gate columns only, layer-2 slots are zero columns
    wih1_8 = _place(p["w_ih_l0"].T, 0, H)                                # (D, 8H)
    # both layers' (b_ih + b_hh) merged into one 8H bias row
    bias8 = (_place((p["b_ih_l0"] + p["b_hh_l0"])[None, :], 0, H)
             + _place((p["b_ih_l1"] + p["b_hh_l1"])[None, :], 1, H))     # (1, 8H)
    # fused recurrent weight: rows [0:H] multiply h1 (layer-1 recurrence + layer-2 input),
    #                         rows [H:2H] multiply h2 (layer-2 recurrence)
    wbig = jnp.concatenate(
        [_place(p["w_hh_l0"].T, 0, H) + _place(p["w_ih_l1"].T, 1, H),
         _place(p["w_hh_l1"].T, 1, H)],
        axis=0)                                                          # (2H, 8H)
    return {
        "wih1_8": wih1_8.astype(jnp.bfloat16),
        "bias8":  bias8,                                                 # f32
        "wbig":   wbig.astype(jnp.bfloat16),
        "wfc_t":  p["fc_w"].T.astype(jnp.bfloat16),
        "bfc":    p["fc_b"][None, :],                                    # f32
    }


def reference_forward(x, p):
    """Pure-JAX f32 reference of the PyTorch forward (PyTorch gate order / layout)."""
    B, T, D = x.shape
    H = p["w_hh_l0"].shape[1]

    def cell(xt, h, c, w_ih, w_hh, b_ih, b_hh):
        gates = xt @ w_ih.T + h @ w_hh.T + b_ih + b_hh
        i = jax.nn.sigmoid(gates[:, 0 * H:1 * H])
        f = jax.nn.sigmoid(gates[:, 1 * H:2 * H])
        g = jnp.tanh(gates[:, 2 * H:3 * H])
        o = jax.nn.sigmoid(gates[:, 3 * H:4 * H])
        c = f * c + i * g
        h = o * jnp.tanh(c)
        return h, c

    h1 = c1 = h2 = c2 = jnp.zeros((B, H), jnp.float32)
    for t in range(T):
        h1, c1 = cell(x[:, t, :], h1, c1, p["w_ih_l0"], p["w_hh_l0"], p["b_ih_l0"], p["b_hh_l0"])
        h2, c2 = cell(h1, h2, c2, p["w_ih_l1"], p["w_hh_l1"], p["b_ih_l1"], p["b_hh_l1"])
    return h2 @ p["fc_w"].T + p["fc_b"]


if __name__ == "__main__":
    # small shapes consistent with the module's forward: (batch, seq, input_size)
    B, T, D, H, O = 2, 8, 64, 32, 6

    key = jax.random.PRNGKey(0)
    kx, kp = jax.random.split(key)
    x = jax.random.normal(kx, (B, T, D), jnp.float32)

    torch_params = init_torch_like_params(kp, D, H, O)
    kparams = prepare_kernel_params(torch_params)

    out = jax.block_until_ready(pose_estimation_lstm_forward(x, kparams))
    ref = reference_forward(x, torch_params)

    assert out.shape == (B, O)
    # bf16 matmul operands with f32 accumulation -> slightly looser tolerance vs f32 reference
    assert jnp.allclose(out, ref, atol=3e-2, rtol=3e-2), (
        f"Pallas LSTM mismatch vs reference (max abs diff {jnp.max(jnp.abs(out - ref))})")

    print("KERNEL_OK")
</pallas_src>

<mosaic_0001>
module attributes {stable_mosaic.version = 11 : i64} {
  func.func @lstm_fc_kernel(%arg0: memref<72x64xbf16, #tpu.memory_space<vmem>>, %arg1: memref<64x256xbf16, #tpu.memory_space<vmem>>, %arg2: memref<1x256xf32, #tpu.memory_space<vmem>>, %arg3: memref<64x256xbf16, #tpu.memory_space<vmem>>, %arg4: memref<32x6xbf16, #tpu.memory_space<vmem>>, %arg5: memref<1x6xf32, #tpu.memory_space<vmem>>, %arg6: memref<8x6xf32, #tpu.memory_space<vmem>>) attributes {dimension_semantics = [], scalar_prefetch = 0 : i64, scratch_operands = 0 : i64, tpu.core_type = #tpu.core_type<tc>} {
    %c0 = arith.constant 0 : index
    %c0_0 = arith.constant 0 : index
    %0 = vector.load %arg0[%c0, %c0_0] : memref<72x64xbf16, #tpu.memory_space<vmem>>, vector<72x64xbf16>
    %c0_1 = arith.constant 0 : index
    %c0_2 = arith.constant 0 : index
    %1 = vector.load %arg1[%c0_1, %c0_2] : memref<64x256xbf16, #tpu.memory_space<vmem>>, vector<64x256xbf16>
    %cst = arith.constant dense<0.000000e+00> : vector<72x256xf32>
    %2 = tpu.matmul %0, %1, %cst {dimension_numbers = #tpu.dot_dimension_numbers<[1], [0], [0], [1], [0, 0, 1, 1], [], []>} : vector<72x64xbf16>, vector<64x256xbf16>, vector<72x256xf32> -> vector<72x256xf32>
    %c0_3 = arith.constant 0 : index
    %c0_4 = arith.constant 0 : index
    %3 = vector.load %arg2[%c0_3, %c0_4] : memref<1x256xf32, #tpu.memory_space<vmem>>, vector<1x256xf32>
    %4 = vector.broadcast %3 : vector<1x256xf32> to vector<72x256xf32>
    %5 = arith.addf %2, %4 : vector<72x256xf32>
    %c0_5 = arith.constant 0 : index
    %c0_6 = arith.constant 0 : index
    %6 = vector.load %arg3[%c0_5, %c0_6] : memref<64x256xbf16, #tpu.memory_space<vmem>>, vector<64x256xbf16>
    %7 = tpu.iota {dimensions = array<i32: 1>} : vector<1x64xi32>
    %c32_i32 = arith.constant 32 : i32
    %8 = vector.broadcast %c32_i32 : i32 to vector<1x64xi32>
    %9 = arith.cmpi slt, %7, %8 : vector<1x64xi32>
    %10 = arith.extui %9 : vector<1x64xi1> to vector<1x64xi32>
    %11 = arith.sitofp %10 : vector<1x64xi32> to vector<1x64xf32>
    %cst_7 = arith.constant 0.000000e+00 : f32
    %12 = vector.broadcast %cst_7 : f32 to vector<8x64xf32>
    %13 = vector.extract_strided_slice %5 {offsets = [0, 0], sizes = [8, 256], strides = [1, 1]} : vector<72x256xf32> to vector<8x256xf32>
    %14 = vector.extract_strided_slice %13 {offsets = [0, 0], sizes = [8, 192], strides = [1, 1]} : vector<8x256xf32> to vector<8x192xf32>
    %15 = arith.negf %14 : vector<8x192xf32>
    %16 = math.exp %15 : vector<8x192xf32>
    %cst_8 = arith.constant 1.000000e+00 : f32
    %17 = vector.broadcast %cst_8 : f32 to vector<8x192xf32>
    %18 = arith.addf %17, %16 : vector<8x192xf32>
    %19 = arith.divf %17, %18 : vector<8x192xf32>
    %20 = vector.extract_strided_slice %13 {offsets = [0, 192], sizes = [8, 64], strides = [1, 1]} : vector<8x256xf32> to vector<8x64xf32>
    %21 = math.tanh %20 : vector<8x64xf32>
    %22 = vector.extract_strided_slice %19 {offsets = [0, 0], sizes = [8, 64], strides = [1, 1]} : vector<8x192xf32> to vector<8x64xf32>
    %23 = vector.broadcast %11 : vector<1x64xf32> to vector<8x64xf32>
    %24 = arith.mulf %22, %23 : vector<8x64xf32>
    %25 = vector.extract_strided_slice %19 {offsets = [0, 64], sizes = [8, 64], strides = [1, 1]} : vector<8x192xf32> to vector<8x64xf32>
    %26 = arith.mulf %25, %12 : vector<8x64xf32>
    %27 = arith.mulf %24, %21 : vector<8x64xf32>
    %28 = arith.addf %26, %27 : vector<8x64xf32>
    %29 = vector.extract_strided_slice %19 {offsets = [0, 128], sizes = [8, 64], strides = [1, 1]} : vector<8x192xf32> to vector<8x64xf32>
    %30 = math.tanh %28 : vector<8x64xf32>
    %31 = arith.mulf %29, %30 : vector<8x64xf32>
    %32 = vector.extract_strided_slice %5 {offsets = [8, 0], sizes = [8, 256], strides = [1, 1]} : vector<72x256xf32> to vector<8x256xf32>
    %33 = arith.truncf %31 : vector<8x64xf32> to vector<8x64xbf16>
    %cst_9 = arith.constant dense<0.000000e+00> : vector<8x256xf32>
    %34 = tpu.matmul %33, %6, %cst_9 {dimension_numbers = #tpu.dot_dimension_numbers<[1], [0], [0], [1], [0, 0, 1, 1], [], []>} : vector<8x64xbf16>, vector<64x256xbf16>, vector<8x256xf32> -> vector<8x256xf32>
    %35 = arith.addf %32, %34 : vector<8x256xf32>
    %36 = vector.extract_strided_slice %35 {offsets = [0, 0], sizes = [8, 192], strides = [1, 1]} : vector<8x256xf32> to vector<8x192xf32>
    %37 = arith.negf %36 : vector<8x192xf32>
    %38 = math.exp %37 : vector<8x192xf32>
    %cst_10 = arith.constant 1.000000e+00 : f32
    %39 = vector.broadcast %cst_10 : f32 to vector<8x192xf32>
    %40 = arith.addf %39, %38 : vector<8x192xf32>
    %41 = arith.divf %39, %40 : vector<8x192xf32>
    %42 = vector.extract_strided_slice %35 {offsets = [0, 192], sizes = [8, 64], strides = [1, 1]} : vector<8x256xf32> to vector<8x64xf32>
    %43 = math.tanh %42 : vector<8x64xf32>
    %44 = vector.extract_strided_slice %41 {offsets = [0, 0], sizes = [8, 64], strides = [1, 1]} : vector<8x192xf32> to vector<8x64xf32>
    %45 = vector.extract_strided_slice %41 {offsets = [0, 64], sizes = [8, 64], strides = [1, 1]} : vector<8x192xf32> to vector<8x64xf32>
    %46 = arith.mulf %45, %28 : vector<8x64xf32>
    %47 = arith.mulf %44, %43 : vector<8x64xf32>
    %48 = arith.addf %46, %47 : vector<8x64xf32>
    %49 = vector.extract_strided_slice %41 {offsets = [0, 128], sizes = [8, 64], strides = [1, 1]} : vector<8x192xf32> to vector<8x64xf32>
    %50 = math.tanh %48 : vector<8x64xf32>
    %51 = arith.mulf %49, %50 : vector<8x64xf32>
    %52 = vector.extract_strided_slice %5 {offsets = [16, 0], sizes = [8, 256], strides = [1, 1]} : vector<72x256xf32> to vector<8x256xf32>
    %53 = arith.truncf %51 : vector<8x64xf32> to vector<8x64xbf16>
    %cst_11 = arith.constant dense<0.000000e+00> : vector<8x256xf32>
    %54 = tpu.matmul %53, %6, %cst_11 {dimension_numbers = #tpu.dot_dimension_numbers<[1], [0], [0], [1], [0, 0, 1, 1], [], []>} : vector<8x64xbf16>, vector<64x256xbf16>, vector<8x256xf32> -> vector<8x256xf32>
    %55 = arith.addf %52, %54 : vector<8x256xf32>
    %56 = vector.extract_strided_slice %55 {offsets = [0, 0], sizes = [8, 192], strides = [1, 1]} : vector<8x256xf32> to vector<8x192xf32>
    %57 = arith.negf %56 : vector<8x192xf32>
    %58 = math.exp %57 : vector<8x192xf32>
    %cst_12 = arith.constant 1.000000e+00 : f32
    %59 = vector.broadcast %cst_12 : f32 to vector<8x192xf32>
    %60 = arith.addf %59, %58 : vector<8x192xf32>
    %61 = arith.divf %59, %60 : vector<8x192xf32>
    %62 = vector.extract_strided_slice %55 {offsets = [0, 192], sizes = [8, 64], strides = [1, 1]} : vector<8x256xf32> to vector<8x64xf32>
    %63 = math.tanh %62 : vector<8x64xf32>
    %64 = vector.extract_strided_slice %61 {offsets = [0, 0], sizes = [8, 64], strides = [1, 1]} : vector<8x192xf32> to vector<8x64xf32>
    %65 = vector.extract_strided_slice %61 {offsets = [0, 64], sizes = [8, 64], strides = [1, 1]} : vector<8x192xf32> to vector<8x64xf32>
    %66 = arith.mulf %65, %48 : vector<8x64xf32>
    %67 = arith.mulf %64, %63 : vector<8x64xf32>
    %68 = arith.addf %66, %67 : vector<8x64xf32>
    %69 = vector.extract_strided_slice %61 {offsets = [0, 128], sizes = [8, 64], strides = [1, 1]} : vector<8x192xf32> to vector<8x64xf32>
    %70 = math.tanh %68 : vector<8x64xf32>
    %71 = arith.mulf %69, %70 : vector<8x64xf32>
    %72 = vector.extract_strided_slice %5 {offsets = [24, 0], sizes = [8, 256], strides = [1, 1]} : vector<72x256xf32> to vector<8x256xf32>
    %73 = arith.truncf %71 : vector<8x64xf32> to vector<8x64xbf16>
    %cst_13 = arith.constant dense<0.000000e+00> : vector<8x256xf32>
    %74 = tpu.matmul %73, %6, %cst_13 {dimension_numbers = #tpu.dot_dimension_numbers<[1], [0], [0], [1], [0, 0, 1, 1], [], []>} : vector<8x64xbf16>, vector<64x256xbf16>, vector<8x256xf32> -> vector<8x256xf32>
    %75 = arith.addf %72, %74 : vector<8x256xf32>
    %76 = vector.extract_strided_slice %75 {offsets = [0, 0], sizes = [8, 192], strides = [1, 1]} : vector<8x256xf32> to vector<8x192xf32>
    %77 = arith.negf %76 : vector<8x192xf32>
    %78 = math.exp %77 : vector<8x192xf32>
    %cst_14 = arith.constant 1.000000e+00 : f32
    %79 = vector.broadcast %cst_14 : f32 to vector<8x192xf32>
    %80 = arith.addf %79, %78 : vector<8x192xf32>
    %81 = arith.divf %79, %80 : vector<8x192xf32>
    %82 = vector.extract_strided_slice %75 {offsets = [0, 192], sizes = [8, 64], strides = [1, 1]} : vector<8x256xf32> to vector<8x64xf32>
    %83 = math.tanh %82 : vector<8x64xf32>
    %84 = vector.extract_strided_slice %81 {offsets = [0, 0], sizes = [8, 64], strides = [1, 1]} : vector<8x192xf32> to vector<8x64xf32>
    %85 = vector.extract_strided_slice %81 {offsets = [0, 64], sizes = [8, 64], strides = [1, 1]} : vector<8x192xf32> to vector<8x64xf32>
    %86 = arith.mulf %85, %68 : vector<8x64xf32>
    %87 = arith.mulf %84, %83 : vector<8x64xf32>
    %88 = arith.addf %86, %87 : vector<8x64xf32>
    %89 = vector.extract_strided_slice %81 {offsets = [0, 128], sizes = [8, 64], strides = [1, 1]} : vector<8x192xf32> to vector<8x64xf32>
    %90 = math.tanh %88 : vector<8x64xf32>
    %91 = arith.mulf %89, %90 : vector<8x64xf32>
    %92 = vector.extract_strided_slice %5 {offsets = [32, 0], sizes = [8, 256], strides = [1, 1]} : vector<72x256xf32> to vector<8x256xf32>
    %93 = arith.truncf %91 : vector<8x64xf32> to vector<8x64xbf16>
    %cst_15 = arith.constant dense<0.000000e+00> : vector<8x256xf32>
    %94 = tpu.matmul %93, %6, %cst_15 {dimension_numbers = #tpu.dot_dimension_numbers<[1], [0], [0], [1], [0, 0, 1, 1], [], []>} : vector<8x64xbf16>, vector<64x256xbf16>, vector<8x256xf32> -> vector<8x256xf32>
    %95 = arith.addf %92, %94 : vector<8x256xf32>
    %96 = vector.extract_strided_slice %95 {offsets = [0, 0], sizes = [8, 192], strides = [1, 1]} : vector<8x256xf32> to vector<8x192xf32>
    %97 = arith.negf %96 : vector<8x192xf32>
    %98 = math.exp %97 : vector<8x192xf32>
    %cst_16 = arith.constant 1.000000e+00 : f32
    %99 = vector.broadcast %cst_16 : f32 to vector<8x192xf32>
    %100 = arith.addf %99, %98 : vector<8x192xf32>
    %101 = arith.divf %99, %100 : vector<8x192xf32>
    %102 = vector.extract_strided_slice %95 {offsets = [0, 192], sizes = [8, 64], strides = [1, 1]} : vector<8x256xf32> to vector<8x64xf32>
    %103 = math.tanh %102 : vector<8x64xf32>
    %104 = vector.extract_strided_slice %101 {offsets = [0, 0], sizes = [8, 64], strides = [1, 1]} : vector<8x192xf32> to vector<8x64xf32>
    %105 = vector.extract_strided_slice %101 {offsets = [0, 64], sizes = [8, 64], strides = [1, 1]} : vector<8x192xf32> to vector<8x64xf32>
    %106 = arith.mulf %105, %88 : vector<8x64xf32>
    %107 = arith.mulf %104, %103 : vector<8x64xf32>
    %108 = arith.addf %106, %107 : vector<8x64xf32>
    %109 = vector.extract_strided_slice %101 {offsets = [0, 128], sizes = [8, 64], strides = [1, 1]} : vector<8x192xf32> to vector<8x64xf32>
    %110 = math.tanh %108 : vector<8x64xf32>
    %111 = arith.mulf %109, %110 : vector<8x64xf32>
    %112 = vector.extract_strided_slice %5 {offsets = [40, 0], sizes = [8, 256], strides = [1, 1]} : vector<72x256xf32> to vector<8x256xf32>
    %113 = arith.truncf %111 : vector<8x64xf32> to vector<8x64xbf16>
    %cst_17 = arith.constant dense<0.000000e+00> : vector<8x256xf32>
    %114 = tpu.matmul %113, %6, %cst_17 {dimension_numbers = #tpu.dot_dimension_numbers<[1], [0], [0], [1], [0, 0, 1, 1], [], []>} : vector<8x64xbf16>, vector<64x256xbf16>, vector<8x256xf32> -> vector<8x256xf32>
    %115 = arith.addf %112, %114 : vector<8x256xf32>
    %116 = vector.extract_strided_slice %115 {offsets = [0, 0], sizes = [8, 192], strides = [1, 1]} : vector<8x256xf32> to vector<8x192xf32>
    %117 = arith.negf %116 : vector<8x192xf32>
    %118 = math.exp %117 : vector<8x192xf32>
    %cst_18 = arith.constant 1.000000e+00 : f32
    %119 = vector.broadcast %cst_18 : f32 to vector<8x192xf32>
    %120 = arith.addf %119, %118 : vector<8x192xf32>
    %121 = arith.divf %119, %120 : vector<8x192xf32>
    %122 = vector.extract_strided_slice %115 {offsets = [0, 192], sizes = [8, 64], strides = [1, 1]} : vector<8x256xf32> to vector<8x64xf32>
    %123 = math.tanh %122 : vector<8x64xf32>
    %124 = vector.extract_strided_slice %121 {offsets = [0, 0], sizes = [8, 64], strides = [1, 1]} : vector<8x192xf32> to vector<8x64xf32>
    %125 = vector.extract_strided_slice %121 {offsets = [0, 64], sizes = [8, 64], strides = [1, 1]} : vector<8x192xf32> to vector<8x64xf32>
    %126 = arith.mulf %125, %108 : vector<8x64xf32>
    %127 = arith.mulf %124, %123 : vector<8x64xf32>
    %128 = arith.addf %126, %127 : vector<8x64xf32>
    %129 = vector.extract_strided_slice %121 {offsets = [0, 128], sizes = [8, 64], strides = [1, 1]} : vector<8x192xf32> to vector<8x64xf32>
    %130 = math.tanh %128 : vector<8x64xf32>
    %131 = arith.mulf %129, %130 : vector<8x64xf32>
    %132 = vector.extract_strided_slice %5 {offsets = [48, 0], sizes = [8, 256], strides = [1, 1]} : vector<72x256xf32> to vector<8x256xf32>
    %133 = arith.truncf %131 : vector<8x64xf32> to vector<8x64xbf16>
    %cst_19 = arith.constant dense<0.000000e+00> : vector<8x256xf32>
    %134 = tpu.matmul %133, %6, %cst_19 {dimension_numbers = #tpu.dot_dimension_numbers<[1], [0], [0], [1], [0, 0, 1, 1], [], []>} : vector<8x64xbf16>, vector<64x256xbf16>, vector<8x256xf32> -> vector<8x256xf32>
    %135 = arith.addf %132, %134 : vector<8x256xf32>
    %136 = vector.extract_strided_slice %135 {offsets = [0, 0], sizes = [8, 192], strides = [1, 1]} : vector<8x256xf32> to vector<8x192xf32>
    %137 = arith.negf %136 : vector<8x192xf32>
    %138 = math.exp %137 : vector<8x192xf32>
    %cst_20 = arith.constant 1.000000e+00 : f32
    %139 = vector.broadcast %cst_20 : f32 to vector<8x192xf32>
    %140 = arith.addf %139, %138 : vector<8x192xf32>
    %141 = arith.divf %139, %140 : vector<8x192xf32>
    %142 = vector.extract_strided_slice %135 {offsets = [0, 192], sizes = [8, 64], strides = [1, 1]} : vector<8x256xf32> to vector<8x64xf32>
    %143 = math.tanh %142 : vector<8x64xf32>
    %144 = vector.extract_strided_slice %141 {offsets = [0, 0], sizes = [8, 64], strides = [1, 1]} : vector<8x192xf32> to vector<8x64xf32>
    %145 = vector.extract_strided_slice %141 {offsets = [0, 64], sizes = [8, 64], strides = [1, 1]} : vector<8x192xf32> to vector<8x64xf32>
    %146 = arith.mulf %145, %128 : vector<8x64xf32>
    %147 = arith.mulf %144, %143 : vector<8x64xf32>
    %148 = arith.addf %146, %147 : vector<8x64xf32>
    %149 = vector.extract_strided_slice %141 {offsets = [0, 128], sizes = [8, 64], strides = [1, 1]} : vector<8x192xf32> to vector<8x64xf32>
    %150 = math.tanh %148 : vector<8x64xf32>
    %151 = arith.mulf %149, %150 : vector<8x64xf32>
    %152 = vector.extract_strided_slice %5 {offsets = [56, 0], sizes = [8, 256], strides = [1, 1]} : vector<72x256xf32> to vector<8x256xf32>
    %153 = arith.truncf %151 : vector<8x64xf32> to vector<8x64xbf16>
    %cst_21 = arith.constant dense<0.000000e+00> : vector<8x256xf32>
    %154 = tpu.matmul %153, %6, %cst_21 {dimension_numbers = #tpu.dot_dimension_numbers<[1], [0], [0], [1], [0, 0, 1, 1], [], []>} : vector<8x64xbf16>, vector<64x256xbf16>, vector<8x256xf32> -> vector<8x256xf32>
    %155 = arith.addf %152, %154 : vector<8x256xf32>
    %156 = vector.extract_strided_slice %155 {offsets = [0, 0], sizes = [8, 192], strides = [1, 1]} : vector<8x256xf32> to vector<8x192xf32>
    %157 = arith.negf %156 : vector<8x192xf32>
    %158 = math.exp %157 : vector<8x192xf32>
    %cst_22 = arith.constant 1.000000e+00 : f32
    %159 = vector.broadcast %cst_22 : f32 to vector<8x192xf32>
    %160 = arith.addf %159, %158 : vector<8x192xf32>
    %161 = arith.divf %159, %160 : vector<8x192xf32>
    %162 = vector.extract_strided_slice %155 {offsets = [0, 192], sizes = [8, 64], strides = [1, 1]} : vector<8x256xf32> to vector<8x64xf32>
    %163 = math.tanh %162 : vector<8x64xf32>
    %164 = vector.extract_strided_slice %161 {offsets = [0, 0], sizes = [8, 64], strides = [1, 1]} : vector<8x192xf32> to vector<8x64xf32>
    %165 = vector.extract_strided_slice %161 {offsets = [0, 64], sizes = [8, 64], strides = [1, 1]} : vector<8x192xf32> to vector<8x64xf32>
    %166 = arith.mulf %165, %148 : vector<8x64xf32>
    %167 = arith.mulf %164, %163 : vector<8x64xf32>
    %168 = arith.addf %166, %167 : vector<8x64xf32>
    %169 = vector.extract_strided_slice %161 {offsets = [0, 128], sizes = [8, 64], strides = [1, 1]} : vector<8x192xf32> to vector<8x64xf32>
    %170 = math.tanh %168 : vector<8x64xf32>
    %171 = arith.mulf %169, %170 : vector<8x64xf32>
    %172 = vector.extract_strided_slice %5 {offsets = [64, 0], sizes = [8, 256], strides = [1, 1]} : vector<72x256xf32> to vector<8x256xf32>
    %173 = arith.truncf %171 : vector<8x64xf32> to vector<8x64xbf16>
    %cst_23 = arith.constant dense<0.000000e+00> : vector<8x256xf32>
    %174 = tpu.matmul %173, %6, %cst_23 {dimension_numbers = #tpu.dot_dimension_numbers<[1], [0], [0], [1], [0, 0, 1, 1], [], []>} : vector<8x64xbf16>, vector<64x256xbf16>, vector<8x256xf32> -> vector<8x256xf32>
    %175 = arith.addf %172, %174 : vector<8x256xf32>
    %176 = vector.extract_strided_slice %175 {offsets = [0, 0], sizes = [8, 192], strides = [1, 1]} : vector<8x256xf32> to vector<8x192xf32>
    %177 = arith.negf %176 : vector<8x192xf32>
    %178 = math.exp %177 : vector<8x192xf32>
    %cst_24 = arith.constant 1.000000e+00 : f32
    %179 = vector.broadcast %cst_24 : f32 to vector<8x192xf32>
    %180 = arith.addf %179, %178 : vector<8x192xf32>
    %181 = arith.divf %179, %180 : vector<8x192xf32>
    %182 = vector.extract_strided_slice %175 {offsets = [0, 192], sizes = [8, 64], strides = [1, 1]} : vector<8x256xf32> to vector<8x64xf32>
    %183 = math.tanh %182 : vector<8x64xf32>
    %184 = vector.extract_strided_slice %181 {offsets = [0, 0], sizes = [8, 64], strides = [1, 1]} : vector<8x192xf32> to vector<8x64xf32>
    %185 = vector.extract_strided_slice %181 {offsets = [0, 64], sizes = [8, 64], strides = [1, 1]} : vector<8x192xf32> to vector<8x64xf32>
    %186 = arith.mulf %185, %168 : vector<8x64xf32>
    %187 = arith.mulf %184, %183 : vector<8x64xf32>
    %188 = arith.addf %186, %187 : vector<8x64xf32>
    %189 = vector.extract_strided_slice %181 {offsets = [0, 128], sizes = [8, 64], strides = [1, 1]} : vector<8x192xf32> to vector<8x64xf32>
    %190 = math.tanh %188 : vector<8x64xf32>
    %191 = arith.mulf %189, %190 : vector<8x64xf32>
    %192 = vector.extract_strided_slice %191 {offsets = [0, 32], sizes = [8, 32], strides = [1, 1]} : vector<8x64xf32> to vector<8x32xf32>
    %193 = arith.truncf %192 : vector<8x32xf32> to vector<8x32xbf16>
    %c0_25 = arith.constant 0 : index
    %c0_26 = arith.constant 0 : index
    %194 = vector.load %arg4[%c0_25, %c0_26] : memref<32x6xbf16, #tpu.memory_space<vmem>>, vector<32x6xbf16>
    %cst_27 = arith.constant dense<0.000000e+00> : vector<8x6xf32>
    %195 = tpu.matmul %193, %194, %cst_27 {dimension_numbers = #tpu.dot_dimension_numbers<[1], [0], [0], [1], [0, 0, 1, 1], [], []>} : vector<8x32xbf16>, vector<32x6xbf16>, vector<8x6xf32> -> vector<8x6xf32>
    %c0_28 = arith.constant 0 : index
    %c0_29 = arith.constant 0 : index
    %196 = vector.load %arg5[%c0_28, %c0_29] : memref<1x6xf32, #tpu.memory_space<vmem>>, vector<1x6xf32>
    %197 = vector.broadcast %196 : vector<1x6xf32> to vector<8x6xf32>
    %198 = arith.addf %195, %197 : vector<8x6xf32>
    %c0_30 = arith.constant 0 : index
    %c0_31 = arith.constant 0 : index
    %199 = vector.load %arg6[%c0_30, %c0_31] : memref<8x6xf32, #tpu.memory_space<vmem>>, vector<8x6xf32>
    tpu.vector_store %arg6[%c0_30, %c0_31], %198 {strides = array<i32>} : memref<8x6xf32, #tpu.memory_space<vmem>>, vector<8x6xf32>,
    return
  }
}

</mosaic_0001>

<bundles_post_ra>
// kernel: tpu_custom_call.1
= control target key start
LH: loop header
LB: loop body
LE: loop exit
PB: predicated region body
PF: predicated region fallthrough
CT: control target
= control target key end

     0   :  { %11 = vsyncpa [#allocation3], 0  ;;  %s1725_s0 = inlined_call_operand.vmem [shape: bf16[72,64], index: 0, kind: input, shape index: {}]   ;;  %s1726_s1 = inlined_call_operand.vmem [shape: bf16[64,256], index: 1, kind: input, shape index: {}]   ;;  %s1727_s2 = inlined_call_operand.vmem [shape: f32[1,256], index: 2, kind: input, shape index: {}]   ;;  %s1728_s3 = inlined_call_operand.hbm [shape: bf16[64,256], index: 3, kind: input, shape index: {}]   ;;  %s1729_s4 = inlined_call_operand.vmem [shape: bf16[32,6], index: 4, kind: input, shape index: {}]   ;;  %s1730_s5 = inlined_call_operand.vmem [shape: f32[1,6], index: 5, kind: input, shape index: {}]   ;;  %s1731_s6 = inlined_call_operand.hbm [shape: f32[8,6], index: 6, kind: output, shape index: {}]  }
   0x1   :  { %12 = vsyncpa [#allocation4], 0  ;;  %s23_s23 = sshll.u32 %s1728_s3, 4  ;;  %s1407_s24 = smov [#allocation2]   ;;  %s24_s23 = int_to_ptr.hbm [resolvable:$true] %s23_s23 }
   0x2   :  { %s25_s25 = sshll.u32 %s1407_s24, 4  ;;  %s1408_s26 = smov 128   ;;  %s26_s25 = int_to_ptr.vmem [resolvable:$true] %s25_s25 }
   0x3   :  { %s1409_s27 = smov 8  }
   0x4   :  { %31 = dma.hbm_to_vmem [thread:$0]  %s24_s23, 1024, %s26_s25, [#allocation3], %s1408_s26, %s1408_s26, %s1409_s27  }
   0x5   :  { %1403 = dma.done.wait [#allocation3], 1024  }
   0x6   :  { %1404 = vsyncadd [#allocation3], 4294966272  ;;  %v1227_v0 = vld [vmem:[%s1726_s1 + $0x34] sm:$0xf]  ;;  %v1127_v1 = vld [vmem:[%s1726_s1 + $0x38] sm:$0xf0]  ;;  %v217_v39 = vlaneseq }
   0x7   :  { %v1225_v2 = vld [vmem:[%s1726_s1 + $0x24] sm:$0xf]  ;;  %v1130_v3 = vor.u32 %v1227_v0, %v1127_v1  ;;  %v1119_v4 = vld [vmem:[%s1726_s1 + $0x28] sm:$0xf0]  ;;  %v1125_v6 = vld [vmem:[%s1726_s1 + $0x30] sm:$0xf] }
   0x8   :  { %v1122_v5 = vor.u32 %v1225_v2, %v1119_v4  ;;  %v1228_v7 = vld [vmem:[%s1726_s1 + $0x34] sm:$0xf0]  ;;  %v1117_v8 = vld [vmem:[%s1726_s1 + $0x20] sm:$0xf]  ;;  %v1223_v9 = vld [vmem:[%s1726_s1 + $0x14] sm:$0xf] }
   0x9   :  { %180 = vmatpush.bf16.msra.mxu1 %v1130_v3  ;;  %v1111_v10 = vld [vmem:[%s1726_s1 + $0x18] sm:$0xf0]  ;;  %v1126_v11 = vor.u32 %v1228_v7, %v1125_v6  ;;  %v1226_v12 = vld [vmem:[%s1726_s1 + $0x24] sm:$0xf0]  ;;  %v1109_v15 = vld [vmem:[%s1726_s1 + $0x10] sm:$0xf] }
   0xa   :  { %v1118_v13 = vor.u32 %v1226_v12, %v1117_v8  ;;  %v1114_v14 = vor.u32 %v1223_v9, %v1111_v10  ;;  %v1224_v16 = vld [vmem:[%s1726_s1 + $0x14] sm:$0xf0]  ;;  %v1221_v17 = vld [vmem:[%s1726_s1 + $0x4] sm:$0xf]  ;;  %v1103_v18 = vld [vmem:[%s1726_s1 + $0x8] sm:$0xf0] }
   0xb   :  { %147 = vmatpush.bf16.msra.mxu0 %v1126_v11  ;;  %v1110_v19 = vor.u32 %v1224_v16, %v1109_v15  ;;  %v1106_v20 = vor.u32 %v1221_v17, %v1103_v18  ;;  %v1101_v21 = vld [vmem:[%s1726_s1] sm:$0xf]  ;;  %v1222_v22 = vld [vmem:[%s1726_s1 + $0x4] sm:$0xf0]  ;;  %vm127_vm0 = vcmask 523264   ;;  %s1410_s1 = smov 64  }
   0xc   :  { %v1217_v23 = vld [vmem:[%s1725_s0] sm:$0xff]  ;;  %v1102_v24 = vor.u32 %v1222_v22, %v1101_v21  ;;  %v218_v42 = vand.u32 127, %v217_v39  ;;  %v1411_v47 = vmov 0.0   ;;  %v1170_v53 = vld [vmem:[#allocation2 + $0x30] sm:$0xf]  ;;  %s1412_s24 = smov 96  }
   0xd   :  { %181 = vmatpush.bf16.msra.mxu1 %v1122_v5  ;;  %v58_v25 = vld [vmem:[%s1727_s2] sm:$0x3]  ;;  %v1236_v54 = vld [vmem:[#allocation2 + $0x34] sm:$0xf0]  ;;  %v1235_v55 = vld [vmem:[#allocation2 + $0x34] sm:$0xf] }
   0xe   :  { %v1508_v26 = vperm.slane %v58_v25, 1  ;;  %v1515_v30 = vperm.slane %v58_v25, 0  ;;  %vm219_vm4 = vcmp.lt.s32.totalorder %v218_v42, 32  ;;  %v1519_v56 = vor.u32 %v1236_v54, %v1170_v53  ;;  %v1172_v57 = vld [vmem:[#allocation2 + $0x38] sm:$0xf0]  ;;  %s1413_s26 = smov [#allocation5]  }
   0xf   :  { %148 = vmatpush.bf16.msra.mxu0 %v1118_v13  ;;  %v1141_v48 = vsel %vm219_vm4, 1.0, %v1411_v47  ;;  %v1162_v58 = vld [vmem:[#allocation2 + $0x20] sm:$0xf]  ;;  %v1234_v59 = vld [vmem:[#allocation2 + $0x24] sm:$0xf0]  ;;  %v1521_v60 = vor.u32 %v1235_v55, %v1172_v57  ;;  %s1071_s27 = sshll.u32 %s1413_s26, 4  ;;  %s1072_s27 = int_to_ptr.vmem [resolvable:$true] %s1071_s27 }
  0x10   :  { %v1233_v61 = vld [vmem:[#allocation2 + $0x24] sm:$0xf]  ;;  %v1164_v62 = vld [vmem:[#allocation2 + $0x28] sm:$0xf0]  ;;  %327 = vmatpush.bf16.msra.mxu2 %v1519_v56  ;;  %v1524_v63 = vor.u32 %v1234_v59, %v1162_v58  ;;  %v1154_v1 = vld [vmem:[#allocation2 + $0x10] sm:$0xf] }
  0x11   :  { %182 = vmatpush.bf16.msra.mxu1 %v1114_v14  ;;  %340 = vmatpush.bf16.msra.mxu3 %v1521_v60  ;;  %v1528_v0 = vor.u32 %v1233_v61, %v1164_v62  ;;  %v1232_v2 = vld [vmem:[#allocation2 + $0x14] sm:$0xf0]  ;;  %v1231_v3 = vld [vmem:[#allocation2 + $0x14] sm:$0xf]  ;;  %v1156_v4 = vld [vmem:[#allocation2 + $0x18] sm:$0xf0] }
  0x12   :  { %v1532_v5 = vor.u32 %v1232_v2, %v1154_v1  ;;  %v1536_v6 = vor.u32 %v1231_v3, %v1156_v4  ;;  %v1146_v13 = vld [vmem:[#allocation2] sm:$0xf]  ;;  %v1230_v14 = vld [vmem:[#allocation2 + $0x4] sm:$0xf0]  ;;  %v1229_v15 = vld [vmem:[#allocation2 + $0x4] sm:$0xf] }
  0x13   :  { %149 = vmatpush.bf16.msra.mxu0 %v1110_v19  ;;  %v1548_v17 = vor.u32 %v1230_v14, %v1146_v13  ;;  %v1148_v18 = vld [vmem:[#allocation2 + $0x8] sm:$0xf0]  ;;  %s1073_s30 = sshll.u32 %s1731_s6, 4  ;;  %s1074_s30 = int_to_ptr.hbm [resolvable:$true] %s1073_s30 }
  0x14   :  { %328 = vmatpush.bf16.msra.mxu2 %v1524_v63  ;;  %v1550_v19 = vor.u32 %v1229_v15, %v1148_v18 }
  0x15   :  { %183 = vmatpush.bf16.msra.mxu1 %v1106_v20  ;;  %341 = vmatpush.bf16.msra.mxu3 %v1528_v0 }
  0x17   :  { %150 = vmatpush.bf16.msra.mxu0 %v1102_v24 }
  0x18   :  { %1136 = vmatmul.msk.bf16.vlgmr.msra.gmra.mxu1 %vm127_vm0, %v1217_v23  ;;  %329 = vmatpush.bf16.msra.mxu2 %v1532_v5 }
  0x19   :  { %780 = vmatpush.bf16.msrb.mxu1 %v1521_v60  ;;  %342 = vmatpush.bf16.msra.mxu3 %v1536_v6 }
  0x1a   :  { %1131 = vmatmul.msk.bf16.vlgmr.msra.gmra.mxu0 %vm127_vm0, %v1217_v23 }
  0x1b   :  { %767 = vmatpush.bf16.msrb.mxu0 %v1519_v56 }
  0x1c   :  { %330 = vmatpush.bf16.msra.mxu2 %v1548_v17 }
  0x1d   :  { %781 = vmatpush.bf16.msrb.mxu1 %v1528_v0  ;;  %343 = vmatpush.bf16.msra.mxu3 %v1550_v19 }
  0x1f   :  { %768 = vmatpush.bf16.msrb.mxu0 %v1524_v63 }
  0x20   :  { %415 = vmatpush.bf16.msrb.mxu2 %v1519_v56 }
  0x21   :  { %782 = vmatpush.bf16.msrb.mxu1 %v1536_v6  ;;  %428 = vmatpush.bf16.msrb.mxu3 %v1521_v60 }
  0x23   :  { %769 = vmatpush.bf16.msrb.mxu0 %v1532_v5 }
  0x24   :  { %416 = vmatpush.bf16.msrb.mxu2 %v1524_v63 }
  0x25   :  { %783 = vmatpush.bf16.msrb.mxu1 %v1550_v19  ;;  %429 = vmatpush.bf16.msrb.mxu3 %v1528_v0 }
  0x27   :  { %770 = vmatpush.bf16.msrb.mxu0 %v1548_v17 }
  0x28   :  { %417 = vmatpush.bf16.msrb.mxu2 %v1532_v5 }
  0x29   :  { %956 = vmatpush.bf16.msra.mxu1 %v1521_v60  ;;  %430 = vmatpush.bf16.msrb.mxu3 %v1536_v6 }
  0x2b   :  { %943 = vmatpush.bf16.msra.mxu0 %v1519_v56 }
  0x2c   :  { %418 = vmatpush.bf16.msrb.mxu2 %v1548_v17 }
  0x2d   :  { %957 = vmatpush.bf16.msra.mxu1 %v1528_v0  ;;  %431 = vmatpush.bf16.msrb.mxu3 %v1550_v19 }
  0x2f   :  { %944 = vmatpush.bf16.msra.mxu0 %v1524_v63 }
  0x31   :  { %958 = vmatpush.bf16.msra.mxu1 %v1536_v6 }
  0x33   :  { %945 = vmatpush.bf16.msra.mxu0 %v1532_v5 }
  0x35   :  { %959 = vmatpush.bf16.msra.mxu1 %v1550_v19 }
  0x37   :  { %946 = vmatpush.bf16.msra.mxu0 %v1548_v17 }
  0x95   :  { %v185_v27 = vpop.f32.mrf.mxu1 }
  0x96   :  { %v1511_v28 = vadd.f32 %v185_v27, %v1508_v26 }
  0x97   :  { %v152_v31 = vpop.f32.mrf.mxu0 }
  0x98   :  { %1247 = vtanh.f32 %v1511_v28  ;;  %v153_v32 = vadd.f32 %v152_v31, %v1515_v30  ;;  %v1143_v11 = vmul.f32 -1.442695, %v1511_v28 }
  0x9a   :  { %v1142_v33 = vmul.f32 -1.442695, %v153_v32 }
  0x9c   :  { %1249 = vpow2.f32 %v1142_v33 }
  0x9e   :  { %v1248_v29 = vpop.eup %1247 }
  0x9f   :  { %264 = vrot.lane.b32.xlu0 %v1248_v29, %s1410_s1 }
  0xa2   :  { %v1250_v34 = vpop.eup %1249 }
  0xa3   :  { %v228_v35 = vadd.f32 1.0, %v1250_v34 }
  0xa5   :  { %1251 = vrcp.f32 %v228_v35  ;;  %vm235_vm1 = vweird.f32 %v228_v35  ;;  %v241_v41 = vand.u32 2147483648, %v228_v35  ;;  %v239_v44 = vand.u32 2147483647, %v228_v35 }
  0xa7   :  { %v242_v45 = vor.u32 1.1754944e-38, %v241_v41  ;;  %vm240_vm5 = vcmp.eq.f32.partialorder %v239_v44, 8.507059e+37 }
  0xab   :  { %v1252_v36 = vpop.eup %1251 }
  0xac   :  { %v231_v37 = vmul.f32 %v1252_v36, %v228_v35  ;;  %vm236_vm2 = vweird.f32 %v1252_v36  ;;  %v187_v35 = vpop.f32.mrf.mxu1 }
  0xad   :  { %vm237_vm3 = vmor %vm235_vm1, %vm236_vm2 }
  0xae   :  { %v232_v38 = vsub.f32 1.0, %v231_v37 }
  0xb0   :  { %v233_v40 = vmul.f32 %v1252_v36, %v232_v38 }
  0xb2   :  { %v234_v43 = vadd.f32 %v1252_v36, %v233_v40 }
  0xb4   :  { %v238_v46 = vsel %vm237_vm3, %v1252_v36, %v234_v43  ;;  %v188_v36 = vadd.f32 %v187_v35, %v1508_v26  ;;  %v154_v43 = vpop.f32.mrf.mxu0 }
  0xb5   :  { %v243_v49 = vsel %vm240_vm5, %v242_v45, %v238_v46  ;;  %v155_v44 = vadd.f32 %v154_v43, %v1515_v30 }
  0xb6   :  { %v261_v50 = vmul.f32 %v1141_v48, %v243_v49  ;;  %v262_v7 = vmul.f32 0.0, %v243_v49 }
 0x111   :  { %v265_v51 = vpop.permute.xlu0 %264 }
 0x112   :  { %v267_v52 = vmul.f32 %v265_v51, %v261_v50 }
 0x114   :  { %269 = vrot.lane.b32.xlu0 %v267_v52, %s1410_s1 }
 0x186   :  { %v270_v8 = vpop.permute.xlu0 %269 }
 0x187   :  { %v1543_v9 = vadd.f32 %v270_v8, %v262_v7 }
 0x189   :  { %1253 = vtanh.f32 %v1543_v9 }
 0x18a   :  { %1255 = vpow2.f32 %v1143_v11  ;;  %v1218_v11 = vld [vmem:[%s1725_s0 + $0x8] sm:$0xff] }
 0x18b   :  { %1137 = vmatmul.msk.bf16.gmra.mxu1 %vm127_vm0, %v1218_v11  ;;  %1132 = vmatmul.msk.bf16.gmra.mxu0 %vm127_vm0, %v1218_v11 }
 0x18f   :  { %v1254_v10 = vpop.eup %1253 }
 0x190   :  { %275 = vrot.lane.b32.xlu1 %v1254_v10, %s1410_s1  ;;  %v1256_v12 = vpop.eup %1255 }
 0x191   :  { %v229_v16 = vadd.f32 1.0, %v1256_v12 }
 0x193   :  { %1257 = vrcp.f32 %v229_v16  ;;  %v256_v25 = vand.u32 2147483648, %v229_v16  ;;  %vm250_vm7 = vweird.f32 %v229_v16  ;;  %v254_v27 = vand.u32 2147483647, %v229_v16 }
 0x195   :  { %v257_v29 = vor.u32 1.1754944e-38, %v256_v25  ;;  %vm255_vm9 = vcmp.eq.f32.partialorder %v254_v27, 8.507059e+37 }
 0x199   :  { %v1258_v20 = vpop.eup %1257 }
 0x19a   :  { %v246_v21 = vmul.f32 %v1258_v20, %v229_v16  ;;  %vm251_vm6 = vweird.f32 %v1258_v20 }
 0x19b   :  { %vm252_vm8 = vmor %vm250_vm7, %vm251_vm6 }
 0x19c   :  { %v247_v22 = vsub.f32 1.0, %v246_v21 }
 0x19e   :  { %v248_v23 = vmul.f32 %v1258_v20, %v247_v22 }
 0x1a0   :  { %v249_v24 = vadd.f32 %v1258_v20, %v248_v23 }
 0x1a2   :  { %v253_v28 = vsel %vm252_vm8, %v1258_v20, %v249_v24 }
 0x1a3   :  { %v258_v31 = vsel %vm255_vm9, %v257_v29, %v253_v28 }
 0x202   :  { %v276_v32 = vpop.permute.xlu1 %275 }
 0x203   :  { %v278_v33 = vmul.f32 %v276_v32, %v258_v31 }
 0x205   :  { %v279_v34 = vpack.c.bf16 %v278_v33, %v278_v33 }
 0x207   :  { %1176 = vmatmul.msk.bf16.vlgmr.msra.gmra.mxu2 %vm127_vm0, %v279_v34  ;;  %1177 = vmatmul.msk.bf16.vlgmr.msra.gmra.mxu3 %vm127_vm0, %v279_v34 }
 0x208   :  { %516 = vmatpush.bf16.msra.mxu3 %v1521_v60  ;;  %503 = vmatpush.bf16.msra.mxu2 %v1519_v56  ;;  %v190_v27 = vpop.f32.mrf.mxu1 }
 0x209   :  { %v191_v28 = vadd.f32 %v190_v27, %v1508_v26 }
 0x20c   :  { %517 = vmatpush.bf16.msra.mxu3 %v1528_v0  ;;  %504 = vmatpush.bf16.msra.mxu2 %v1524_v63 }
 0x210   :  { %518 = vmatpush.bf16.msra.mxu3 %v1536_v6  ;;  %505 = vmatpush.bf16.msra.mxu2 %v1532_v5 }
 0x214   :  { %519 = vmatpush.bf16.msra.mxu3 %v1550_v19  ;;  %506 = vmatpush.bf16.msra.mxu2 %v1548_v17 }
 0x28a   :  { %v332_v37 = vpop.f32.mrf.mxu2  ;;  %v345_v38 = vpop.f32.mrf.mxu3 }
 0x28b   :  { %v350_v39 = vadd.f32 %v345_v38, %v188_v36  ;;  %v349_v45 = vadd.f32 %v332_v37, %v155_v44  ;;  %v157_v36 = vpop.f32.mrf.mxu0 }
 0x28c   :  { %v158_v37 = vadd.f32 %v157_v36, %v1515_v30 }
 0x28d   :  { %1259 = vtanh.f32 %v350_v39  ;;  %v1178_v46 = vmul.f32 -1.442695, %v349_v45  ;;  %v1179_v7 = vmul.f32 -1.442695, %v350_v39 }
 0x28f   :  { %1261 = vpow2.f32 %v1178_v46 }
 0x292   :  { %v334_v40 = vpop.f32.mrf.mxu2  ;;  %v347_v41 = vpop.f32.mrf.mxu3 }
 0x293   :  { %v1260_v42 = vpop.eup %1259  ;;  %v159_v27 = vpop.f32.mrf.mxu0 }
 0x294   :  { %392 = vrot.lane.b32.xlu1 %v1260_v42, %s1410_s1 }
 0x295   :  { %v1262_v47 = vpop.eup %1261 }
 0x296   :  { %v357_v48 = vadd.f32 1.0, %v1262_v47 }
 0x298   :  { %1263 = vrcp.f32 %v357_v48  ;;  %v370_v54 = vand.u32 2147483648, %v357_v48  ;;  %vm364_vm11 = vweird.f32 %v357_v48  ;;  %v368_v55 = vand.u32 2147483647, %v357_v48 }
 0x29a   :  { %v371_v58 = vor.u32 1.1754944e-38, %v370_v54  ;;  %vm369_vm13 = vcmp.eq.f32.partialorder %v368_v55, 8.507059e+37 }
 0x29e   :  { %v1264_v49 = vpop.eup %1263 }
 0x29f   :  { %v360_v50 = vmul.f32 %v1264_v49, %v357_v48  ;;  %vm365_vm10 = vweird.f32 %v1264_v49 }
 0x2a0   :  { %vm366_vm12 = vmor %vm364_vm11, %vm365_vm10 }
 0x2a1   :  { %v361_v51 = vsub.f32 1.0, %v360_v50 }
 0x2a3   :  { %v362_v52 = vmul.f32 %v1264_v49, %v361_v51 }
 0x2a5   :  { %v363_v53 = vadd.f32 %v1264_v49, %v362_v52 }
 0x2a7   :  { %v367_v57 = vsel %vm366_vm12, %v1264_v49, %v363_v53 }
 0x2a8   :  { %v372_v61 = vsel %vm369_vm13, %v371_v58, %v367_v57 }
 0x2a9   :  { %v390_v1 = vmul.f32 %v372_v61, %v1543_v9 }
 0x306   :  { %v393_v59 = vpop.permute.xlu1 %392 }
 0x307   :  { %v395_v62 = vmul.f32 %v393_v59, %v372_v61 }
 0x309   :  { %397 = vrot.lane.b32.xlu2 %v395_v62, %s1410_s1 }
 0x363   :  { %v398_v2 = vpop.permute.xlu2 %397 }
 0x364   :  { %v1587_v3 = vadd.f32 %v398_v2, %v390_v1 }
 0x366   :  { %1265 = vtanh.f32 %v1587_v3 }
 0x367   :  { %1267 = vpow2.f32 %v1179_v7 }
 0x36c   :  { %v1266_v4 = vpop.eup %1265 }
 0x36d   :  { %403 = vrot.lane.b32.xlu2 %v1266_v4, %s1410_s1  ;;  %v1268_v8 = vpop.eup %1267 }
 0x36e   :  { %v358_v10 = vadd.f32 1.0, %v1268_v8 }
 0x370   :  { %1269 = vrcp.f32 %v358_v10  ;;  %v385_v16 = vand.u32 2147483648, %v358_v10  ;;  %vm379_vm15 = vweird.f32 %v358_v10  ;;  %v383_v18 = vand.u32 2147483647, %v358_v10 }
 0x372   :  { %v386_v21 = vor.u32 1.1754944e-38, %v385_v16  ;;  %vm384_vm2 = vcmp.eq.f32.partialorder %v383_v18, 8.507059e+37  ;;  %v192_v16 = vpop.f32.mrf.mxu1 }
 0x373   :  { %v193_v18 = vadd.f32 %v192_v16, %v1508_v26 }
 0x376   :  { %v1270_v9 = vpop.eup %1269 }
 0x377   :  { %v375_v12 = vmul.f32 %v1270_v9, %v358_v10  ;;  %vm380_vm14 = vweird.f32 %v1270_v9 }
 0x378   :  { %vm381_vm1 = vmor %vm379_vm15, %vm380_vm14 }
 0x379   :  { %v376_v13 = vsub.f32 1.0, %v375_v12 }
 0x37b   :  { %v377_v14 = vmul.f32 %v1270_v9, %v376_v13 }
 0x37d   :  { %v378_v15 = vadd.f32 %v1270_v9, %v377_v14 }
 0x37f   :  { %v382_v20 = vsel %vm381_vm1, %v1270_v9, %v378_v15 }
 0x380   :  { %v387_v22 = vsel %vm384_vm2, %v386_v21, %v382_v20 }
 0x3c7   :  { %v404_v23 = vpop.permute.xlu2 %403 }
 0x3c8   :  { %v406_v24 = vmul.f32 %v404_v23, %v387_v22 }
 0x3ca   :  { %v407_v25 = vpack.c.bf16 %v406_v24, %v406_v24 }
 0x3cc   :  { %1180 = vmatmul.msk.bf16.vlgmr.msrb.gmra.mxu2 %vm127_vm0, %v407_v25  ;;  %1181 = vmatmul.msk.bf16.vlgmr.msrb.gmra.mxu3 %vm127_vm0, %v407_v25 }
 0x3cd   :  { %604 = vmatpush.bf16.msrb.mxu3 %v1521_v60  ;;  %591 = vmatpush.bf16.msrb.mxu2 %v1519_v56 }
 0x3d1   :  { %605 = vmatpush.bf16.msrb.mxu3 %v1528_v0  ;;  %592 = vmatpush.bf16.msrb.mxu2 %v1524_v63 }
 0x3d5   :  { %606 = vmatpush.bf16.msrb.mxu3 %v1536_v6  ;;  %593 = vmatpush.bf16.msrb.mxu2 %v1532_v5 }
 0x3d9   :  { %607 = vmatpush.bf16.msrb.mxu3 %v1550_v19  ;;  %594 = vmatpush.bf16.msrb.mxu2 %v1548_v17 }
 0x44f   :  { %v420_v29 = vpop.f32.mrf.mxu2  ;;  %v433_v31 = vpop.f32.mrf.mxu3 }
 0x450   :  { %v438_v32 = vadd.f32 %v433_v31, %v191_v28  ;;  %v437_v38 = vadd.f32 %v420_v29, %v158_v37  ;;  %v160_v28 = vadd.f32 %v159_v27, %v1515_v30 }
 0x452   :  { %1271 = vtanh.f32 %v438_v32  ;;  %v1182_v39 = vmul.f32 -1.442695, %v437_v38  ;;  %v1183_v59 = vmul.f32 -1.442695, %v438_v32 }
 0x454   :  { %1273 = vpow2.f32 %v1182_v39 }
 0x457   :  { %v422_v33 = vpop.f32.mrf.mxu2  ;;  %v435_v34 = vpop.f32.mrf.mxu3 }
 0x458   :  { %v1272_v35 = vpop.eup %1271 }
 0x459   :  { %480 = vrot.lane.b32.xlu0 %v1272_v35, %s1410_s1 }
 0x45a   :  { %v1274_v40 = vpop.eup %1273 }
 0x45b   :  { %v445_v41 = vadd.f32 1.0, %v1274_v40 }
 0x45d   :  { %1275 = vrcp.f32 %v445_v41  ;;  %v458_v47 = vand.u32 2147483648, %v445_v41  ;;  %vm452_vm4 = vweird.f32 %v445_v41  ;;  %v456_v48 = vand.u32 2147483647, %v445_v41 }
 0x45f   :  { %v459_v50 = vor.u32 1.1754944e-38, %v458_v47  ;;  %vm457_vm6 = vcmp.eq.f32.partialorder %v456_v48, 8.507059e+37 }
 0x463   :  { %v1276_v42 = vpop.eup %1275 }
 0x464   :  { %v448_v43 = vmul.f32 %v1276_v42, %v445_v41  ;;  %vm453_vm3 = vweird.f32 %v1276_v42 }
 0x465   :  { %vm454_vm5 = vmor %vm452_vm4, %vm453_vm3 }
 0x466   :  { %v449_v44 = vsub.f32 1.0, %v448_v43 }
 0x468   :  { %v450_v45 = vmul.f32 %v1276_v42, %v449_v44 }
 0x46a   :  { %v451_v46 = vadd.f32 %v1276_v42, %v450_v45 }
 0x46c   :  { %v455_v49 = vsel %vm454_vm5, %v1276_v42, %v451_v46 }
 0x46d   :  { %v460_v52 = vsel %vm457_vm6, %v459_v50, %v455_v49 }
 0x46e   :  { %v478_v54 = vmul.f32 %v460_v52, %v1587_v3 }
 0x4cb   :  { %v481_v51 = vpop.permute.xlu0 %480 }
 0x4cc   :  { %v483_v53 = vmul.f32 %v481_v51, %v460_v52 }
 0x4ce   :  { %485 = vrot.lane.b32.xlu1 %v483_v53, %s1410_s1  ;;  %v1219_v53 = vld [vmem:[%s1725_s0 + $0x10] sm:$0xff] }
 0x4cf   :  { %1138 = vmatmul.msk.bf16.gmra.mxu1 %vm127_vm0, %v1219_v53  ;;  %1133 = vmatmul.msk.bf16.gmra.mxu0 %vm127_vm0, %v1219_v53 }
 0x540   :  { %v486_v55 = vpop.permute.xlu1 %485 }
 0x541   :  { %v1611_v57 = vadd.f32 %v486_v55, %v478_v54 }
 0x543   :  { %1277 = vtanh.f32 %v1611_v57 }
 0x544   :  { %1279 = vpow2.f32 %v1183_v59 }
 0x549   :  { %v1278_v58 = vpop.eup %1277 }
 0x54a   :  { %491 = vrot.lane.b32.xlu2 %v1278_v58, %s1410_s1  ;;  %v1280_v61 = vpop.eup %1279 }
 0x54b   :  { %v446_v62 = vadd.f32 1.0, %v1280_v61 }
 0x54d   :  { %1281 = vrcp.f32 %v446_v62  ;;  %v473_v3 = vand.u32 2147483648, %v446_v62  ;;  %vm467_vm8 = vweird.f32 %v446_v62  ;;  %v471_v10 = vand.u32 2147483647, %v446_v62 }
 0x54f   :  { %v474_v9 = vor.u32 1.1754944e-38, %v473_v3  ;;  %vm472_vm10 = vcmp.eq.f32.partialorder %v471_v10, 8.507059e+37  ;;  %v195_v10 = vpop.f32.mrf.mxu1 }
 0x553   :  { %v1282_v1 = vpop.eup %1281 }
 0x554   :  { %v463_v2 = vmul.f32 %v1282_v1, %v446_v62  ;;  %vm468_vm7 = vweird.f32 %v1282_v1 }
 0x555   :  { %vm469_vm9 = vmor %vm467_vm8, %vm468_vm7 }
 0x556   :  { %v464_v4 = vsub.f32 1.0, %v463_v2 }
 0x558   :  { %v465_v7 = vmul.f32 %v1282_v1, %v464_v4 }
 0x55a   :  { %v466_v8 = vadd.f32 %v1282_v1, %v465_v7 }
 0x55c   :  { %v470_v11 = vsel %vm469_vm9, %v1282_v1, %v466_v8 }
 0x55d   :  { %v475_v12 = vsel %vm472_vm10, %v474_v9, %v470_v11  ;;  %v196_v11 = vadd.f32 %v195_v10, %v1508_v26 }
 0x5a4   :  { %v492_v13 = vpop.permute.xlu2 %491 }
 0x5a5   :  { %v494_v14 = vmul.f32 %v492_v13, %v475_v12 }
 0x5a7   :  { %v495_v15 = vpack.c.bf16 %v494_v14, %v494_v14 }
 0x5a9   :  { %1184 = vmatmul.msk.bf16.vlgmr.msra.gmra.mxu2 %vm127_vm0, %v495_v15  ;;  %1185 = vmatmul.msk.bf16.vlgmr.msra.gmra.mxu3 %vm127_vm0, %v495_v15 }
 0x5aa   :  { %692 = vmatpush.bf16.msra.mxu3 %v1521_v60  ;;  %679 = vmatpush.bf16.msra.mxu2 %v1519_v56 }
 0x5ae   :  { %693 = vmatpush.bf16.msra.mxu3 %v1528_v0  ;;  %680 = vmatpush.bf16.msra.mxu2 %v1524_v63 }
 0x5b2   :  { %694 = vmatpush.bf16.msra.mxu3 %v1536_v6  ;;  %681 = vmatpush.bf16.msra.mxu2 %v1532_v5 }
 0x5b6   :  { %695 = vmatpush.bf16.msra.mxu3 %v1550_v19  ;;  %682 = vmatpush.bf16.msra.mxu2 %v1548_v17 }
 0x62c   :  { %v508_v20 = vpop.f32.mrf.mxu2  ;;  %v521_v21 = vpop.f32.mrf.mxu3 }
 0x62d   :  { %v526_v22 = vadd.f32 %v521_v21, %v193_v18  ;;  %v525_v29 = vadd.f32 %v508_v20, %v160_v28 }
 0x62f   :  { %1283 = vtanh.f32 %v526_v22  ;;  %v1186_v31 = vmul.f32 -1.442695, %v525_v29  ;;  %v1187_v50 = vmul.f32 -1.442695, %v526_v22 }
 0x631   :  { %1285 = vpow2.f32 %v1186_v31 }
 0x634   :  { %v510_v23 = vpop.f32.mrf.mxu2  ;;  %v523_v24 = vpop.f32.mrf.mxu3 }
 0x635   :  { %v1284_v25 = vpop.eup %1283 }
 0x636   :  { %568 = vrot.lane.b32.xlu0 %v1284_v25, %s1410_s1 }
 0x637   :  { %v1286_v32 = vpop.eup %1285 }
 0x638   :  { %v533_v33 = vadd.f32 1.0, %v1286_v32 }
 0x63a   :  { %1287 = vrcp.f32 %v533_v33  ;;  %v546_v39 = vand.u32 2147483648, %v533_v33  ;;  %vm540_vm12 = vweird.f32 %v533_v33  ;;  %v544_v40 = vand.u32 2147483647, %v533_v33 }
 0x63c   :  { %v547_v42 = vor.u32 1.1754944e-38, %v546_v39  ;;  %vm545_vm14 = vcmp.eq.f32.partialorder %v544_v40, 8.507059e+37 }
 0x640   :  { %v1288_v34 = vpop.eup %1287 }
 0x641   :  { %v536_v35 = vmul.f32 %v1288_v34, %v533_v33  ;;  %vm541_vm11 = vweird.f32 %v1288_v34 }
 0x642   :  { %vm542_vm13 = vmor %vm540_vm12, %vm541_vm11 }
 0x643   :  { %v537_v36 = vsub.f32 1.0, %v536_v35 }
 0x645   :  { %v538_v37 = vmul.f32 %v1288_v34, %v537_v36 }
 0x647   :  { %v539_v38 = vadd.f32 %v1288_v34, %v538_v37 }
 0x649   :  { %v543_v41 = vsel %vm542_vm13, %v1288_v34, %v539_v38 }
 0x64a   :  { %v548_v44 = vsel %vm545_vm14, %v547_v42, %v543_v41 }
 0x64b   :  { %v566_v46 = vmul.f32 %v548_v44, %v1611_v57 }
 0x6a8   :  { %v569_v43 = vpop.permute.xlu0 %568 }
 0x6a9   :  { %v571_v45 = vmul.f32 %v569_v43, %v548_v44 }
 0x6ab   :  { %573 = vrot.lane.b32.xlu1 %v571_v45, %s1410_s1 }
 0x71d   :  { %v574_v47 = vpop.permute.xlu1 %573 }
 0x71e   :  { %v1630_v48 = vadd.f32 %v574_v47, %v566_v46 }
 0x720   :  { %1289 = vtanh.f32 %v1630_v48 }
 0x721   :  { %1291 = vpow2.f32 %v1187_v50 }
 0x726   :  { %v1290_v49 = vpop.eup %1289 }
 0x727   :  { %579 = vrot.lane.b32.xlu2 %v1290_v49, %s1410_s1  ;;  %v1292_v51 = vpop.eup %1291 }
 0x728   :  { %v534_v52 = vadd.f32 1.0, %v1292_v51  ;;  %v197_v51 = vpop.f32.mrf.mxu1 }
 0x72a   :  { %1293 = vrcp.f32 %v534_v52  ;;  %v561_v61 = vand.u32 2147483648, %v534_v52  ;;  %vm555_vm1 = vweird.f32 %v534_v52  ;;  %v559_v62 = vand.u32 2147483647, %v534_v52 }
 0x72c   :  { %v562_v2 = vor.u32 1.1754944e-38, %v561_v61  ;;  %vm560_vm3 = vcmp.eq.f32.partialorder %v559_v62, 8.507059e+37 }
 0x730   :  { %v1294_v54 = vpop.eup %1293 }
 0x731   :  { %v551_v55 = vmul.f32 %v1294_v54, %v534_v52  ;;  %vm556_vm15 = vweird.f32 %v1294_v54  ;;  %v198_v52 = vadd.f32 %v197_v51, %v1508_v26 }
 0x732   :  { %vm557_vm2 = vmor %vm555_vm1, %vm556_vm15 }
 0x733   :  { %v552_v57 = vsub.f32 1.0, %v551_v55 }
 0x735   :  { %v553_v58 = vmul.f32 %v1294_v54, %v552_v57 }
 0x737   :  { %v554_v59 = vadd.f32 %v1294_v54, %v553_v58 }
 0x739   :  { %v558_v1 = vsel %vm557_vm2, %v1294_v54, %v554_v59 }
 0x73a   :  { %v563_v4 = vsel %vm560_vm3, %v562_v2, %v558_v1 }
 0x781   :  { %v580_v7 = vpop.permute.xlu2 %579 }
 0x782   :  { %v582_v8 = vmul.f32 %v580_v7, %v563_v4 }
 0x784   :  { %v583_v3 = vpack.c.bf16 %v582_v8, %v582_v8 }
 0x786   :  { %1188 = vmatmul.msk.bf16.vlgmr.msrb.gmra.mxu2 %vm127_vm0, %v583_v3  ;;  %1189 = vmatmul.msk.bf16.vlgmr.msrb.gmra.mxu3 %vm127_vm0, %v583_v3 }
 0x787   :  { %868 = vmatpush.bf16.msrb.mxu3 %v1521_v60  ;;  %855 = vmatpush.bf16.msrb.mxu2 %v1519_v56 }
 0x78b   :  { %869 = vmatpush.bf16.msrb.mxu3 %v1528_v0  ;;  %856 = vmatpush.bf16.msrb.mxu2 %v1524_v63  ;;  %v162_v63 = vpop.f32.mrf.mxu0 }
 0x78f   :  { %870 = vmatpush.bf16.msrb.mxu3 %v1536_v6  ;;  %857 = vmatpush.bf16.msrb.mxu2 %v1532_v5  ;;  %v163_v6 = vadd.f32 %v162_v63, %v1515_v30 }
 0x793   :  { %871 = vmatpush.bf16.msrb.mxu3 %v1550_v19  ;;  %858 = vmatpush.bf16.msrb.mxu2 %v1548_v17  ;;  %v164_v61 = vpop.f32.mrf.mxu0 }
 0x794   :  { %v165_v62 = vadd.f32 %v164_v61, %v1515_v30 }
 0x809   :  { %v596_v9 = vpop.f32.mrf.mxu2  ;;  %v609_v12 = vpop.f32.mrf.mxu3 }
 0x80a   :  { %v614_v60 = vadd.f32 %v609_v12, %v196_v11  ;;  %v613_v5 = vadd.f32 %v596_v9, %v163_v6 }
 0x80c   :  { %1295 = vtanh.f32 %v614_v60  ;;  %v1190_v14 = vmul.f32 -1.442695, %v613_v5  ;;  %v1191_v35 = vmul.f32 -1.442695, %v614_v60  ;;  %v1220_v5 = vld [vmem:[%s1725_s0 + $0x18] sm:$0xff] }
 0x80d   :  { %1139 = vmatmul.msk.bf16.gmra.mxu1 %vm127_vm0, %v1220_v5  ;;  %1134 = vmatmul.msk.bf16.gmra.mxu0 %vm127_vm0, %v1220_v5 }
 0x80e   :  { %1297 = vpow2.f32 %v1190_v14  ;;  %v49_v14 = vld [vmem:[%s1725_s0 + $0x20] sm:$0xf] }
 0x811   :  { %v598_v56 = vpop.f32.mrf.mxu2  ;;  %v611_v13 = vpop.f32.mrf.mxu3 }
 0x812   :  { %v1296_v0 = vpop.eup %1295 }
 0x813   :  { %656 = vrot.lane.b32.xlu0 %v1296_v0, %s1410_s1 }
 0x814   :  { %v1298_v19 = vpop.eup %1297 }
 0x815   :  { %v621_v17 = vadd.f32 1.0, %v1298_v19  ;;  %v81_v19 = vunpack.c.l.b16 %v49_v14 }
 0x817   :  { %1299 = vrcp.f32 %v621_v17  ;;  %v634_v22 = vand.u32 2147483648, %v621_v17  ;;  %vm628_vm5 = vweird.f32 %v621_v17  ;;  %v632_v23 = vand.u32 2147483647, %v621_v17 }
 0x819   :  { %v635_v25 = vor.u32 1.1754944e-38, %v634_v22  ;;  %vm633_vm7 = vcmp.eq.f32.partialorder %v632_v23, 8.507059e+37 }
 0x81d   :  { %v1300_v15 = vpop.eup %1299 }
 0x81e   :  { %v624_v16 = vmul.f32 %v1300_v15, %v621_v17  ;;  %vm629_vm4 = vweird.f32 %v1300_v15  ;;  %v86_v17 = vpack.c.b16 %v81_v19, %v81_v19 }
 0x81f   :  { %vm630_vm6 = vmor %vm628_vm5, %vm629_vm4 }
 0x820   :  { %v625_v18 = vsub.f32 1.0, %v624_v16  ;;  %1140 = vmatmul.msk.bf16.gmra.mxu1 %vm127_vm0, %v86_v17  ;;  %1135 = vmatmul.msk.bf16.gmra.mxu0 %vm127_vm0, %v86_v17 }
 0x822   :  { %v626_v20 = vmul.f32 %v1300_v15, %v625_v18 }
 0x824   :  { %v627_v21 = vadd.f32 %v1300_v15, %v626_v20 }
 0x826   :  { %v631_v24 = vsel %vm630_vm6, %v1300_v15, %v627_v21 }
 0x827   :  { %v636_v28 = vsel %vm633_vm7, %v635_v25, %v631_v24 }
 0x828   :  { %v654_v31 = vmul.f32 %v636_v28, %v1630_v48 }
 0x885   :  { %v657_v27 = vpop.permute.xlu0 %656 }
 0x886   :  { %v659_v29 = vmul.f32 %v657_v27, %v636_v28 }
 0x888   :  { %661 = vrot.lane.b32.xlu1 %v659_v29, %s1410_s1 }
 0x8fa   :  { %v662_v32 = vpop.permute.xlu1 %661 }
 0x8fb   :  { %v1654_v33 = vadd.f32 %v662_v32, %v654_v31 }
 0x8fd   :  { %1301 = vtanh.f32 %v1654_v33 }
 0x8fe   :  { %1303 = vpow2.f32 %v1191_v35 }
 0x903   :  { %v1302_v34 = vpop.eup %1301 }
 0x904   :  { %667 = vrot.lane.b32.xlu2 %v1302_v34, %s1410_s1  ;;  %v1304_v36 = vpop.eup %1303 }
 0x905   :  { %v622_v37 = vadd.f32 1.0, %v1304_v36 }
 0x907   :  { %1305 = vrcp.f32 %v622_v37  ;;  %v649_v43 = vand.u32 2147483648, %v622_v37  ;;  %vm643_vm9 = vweird.f32 %v622_v37  ;;  %v647_v44 = vand.u32 2147483647, %v622_v37 }
 0x909   :  { %v650_v46 = vor.u32 1.1754944e-38, %v649_v43  ;;  %vm648_vm11 = vcmp.eq.f32.partialorder %v647_v44, 8.507059e+37 }
 0x90d   :  { %v1306_v38 = vpop.eup %1305 }
 0x90e   :  { %v639_v39 = vmul.f32 %v1306_v38, %v622_v37  ;;  %vm644_vm8 = vweird.f32 %v1306_v38 }
 0x90f   :  { %vm645_vm10 = vmor %vm643_vm9, %vm644_vm8 }
 0x910   :  { %v640_v40 = vsub.f32 1.0, %v639_v39  ;;  %v200_v39 = vpop.f32.mrf.mxu1 }
 0x912   :  { %v641_v41 = vmul.f32 %v1306_v38, %v640_v40  ;;  %v167_v40 = vpop.f32.mrf.mxu0 }
 0x914   :  { %v642_v42 = vadd.f32 %v1306_v38, %v641_v41 }
 0x916   :  { %v646_v45 = vsel %vm645_vm10, %v1306_v38, %v642_v42 }
 0x917   :  { %v651_v47 = vsel %vm648_vm11, %v650_v46, %v646_v45 }
 0x918   :  { %v1681_v41 = vpop.f32.mrf.mxu1 }
 0x91a   :  { %v1683_v42 = vpop.f32.mrf.mxu0 }
 0x920   :  { %v1685_v43 = vpop.f32.mrf.mxu1 }
 0x922   :  { %v1687_v44 = vpop.f32.mrf.mxu0 }
 0x928   :  { %v207_v45 = vpop.f32.mrf.mxu1 }
 0x92a   :  { %v174_v46 = vpop.f32.mrf.mxu0 }
 0x95e   :  { %v668_v48 = vpop.permute.xlu2 %667 }
 0x95f   :  { %v670_v49 = vmul.f32 %v668_v48, %v651_v47  ;;  %v168_v47 = vadd.f32 %v167_v40, %v1515_v30  ;;  %v201_v48 = vadd.f32 %v200_v39, %v1508_v26 }
 0x961   :  { %v671_v50 = vpack.c.bf16 %v670_v49, %v670_v49 }
 0x963   :  { %1192 = vmatmul.msk.bf16.vlgmr.msra.gmra.mxu2 %vm127_vm0, %v671_v50  ;;  %1193 = vmatmul.msk.bf16.vlgmr.msra.gmra.mxu3 %vm127_vm0, %v671_v50 }
 0x9e6   :  { %v684_v53 = vpop.f32.mrf.mxu2  ;;  %v697_v54 = vpop.f32.mrf.mxu3 }
 0x9e7   :  { %v702_v55 = vadd.f32 %v697_v54, %v198_v52  ;;  %v701_v1 = vadd.f32 %v684_v53, %v165_v62 }
 0x9e9   :  { %1307 = vtanh.f32 %v702_v55  ;;  %v1194_v2 = vmul.f32 -1.442695, %v701_v1  ;;  %v1195_v21 = vmul.f32 -1.442695, %v702_v55 }
 0x9eb   :  { %1309 = vpow2.f32 %v1194_v2 }
 0x9ee   :  { %v686_v57 = vpop.f32.mrf.mxu2  ;;  %v699_v58 = vpop.f32.mrf.mxu3 }
 0x9ef   :  { %v1308_v59 = vpop.eup %1307 }
 0x9f0   :  { %744 = vrot.lane.b32.xlu0 %v1308_v59, %s1410_s1 }
 0x9f1   :  { %v1310_v4 = vpop.eup %1309 }
 0x9f2   :  { %v709_v7 = vadd.f32 1.0, %v1310_v4 }
 0x9f4   :  { %1311 = vrcp.f32 %v709_v7  ;;  %v722_v12 = vand.u32 2147483648, %v709_v7  ;;  %vm716_vm13 = vweird.f32 %v709_v7  ;;  %v720_v60 = vand.u32 2147483647, %v709_v7 }
 0x9f6   :  { %v723_v13 = vor.u32 1.1754944e-38, %v722_v12  ;;  %vm721_vm15 = vcmp.eq.f32.partialorder %v720_v60, 8.507059e+37 }
 0x9fa   :  { %v1312_v8 = vpop.eup %1311 }
 0x9fb   :  { %v712_v3 = vmul.f32 %v1312_v8, %v709_v7  ;;  %vm717_vm12 = vweird.f32 %v1312_v8 }
 0x9fc   :  { %vm718_vm14 = vmor %vm716_vm13, %vm717_vm12 }
 0x9fd   :  { %v713_v10 = vsub.f32 1.0, %v712_v3 }
 0x9ff   :  { %v714_v11 = vmul.f32 %v1312_v8, %v713_v10 }
 0xa01   :  { %v715_v9 = vadd.f32 %v1312_v8, %v714_v11 }
 0xa03   :  { %v719_v56 = vsel %vm718_vm14, %v1312_v8, %v715_v9 }
 0xa04   :  { %v724_v63 = vsel %vm721_vm15, %v723_v13, %v719_v56 }
 0xa05   :  { %v742_v15 = vmul.f32 %v724_v63, %v1654_v33 }
 0xa62   :  { %v745_v0 = vpop.permute.xlu0 %744 }
 0xa63   :  { %v747_v6 = vmul.f32 %v745_v0, %v724_v63 }
 0xa65   :  { %749 = vrot.lane.b32.xlu1 %v747_v6, %s1410_s1 }
 0xad7   :  { %v750_v16 = vpop.permute.xlu1 %749 }
 0xad8   :  { %v1675_v18 = vadd.f32 %v750_v16, %v742_v15 }
 0xada   :  { %1313 = vtanh.f32 %v1675_v18 }
 0xadb   :  { %1315 = vpow2.f32 %v1195_v21 }
 0xae0   :  { %v1314_v20 = vpop.eup %1313 }
 0xae1   :  { %755 = vrot.lane.b32.xlu2 %v1314_v20, %s1410_s1  ;;  %v1316_v22 = vpop.eup %1315 }
 0xae2   :  { %v710_v23 = vadd.f32 1.0, %v1316_v22 }
 0xae4   :  { %1317 = vrcp.f32 %v710_v23  ;;  %v737_v31 = vand.u32 2147483648, %v710_v23  ;;  %vm731_vm2 = vweird.f32 %v710_v23  ;;  %v735_v32 = vand.u32 2147483647, %v710_v23 }
 0xae6   :  { %v738_v34 = vor.u32 1.1754944e-38, %v737_v31  ;;  %vm736_vm4 = vcmp.eq.f32.partialorder %v735_v32, 8.507059e+37 }
 0xaea   :  { %v1318_v24 = vpop.eup %1317 }
 0xaeb   :  { %v727_v25 = vmul.f32 %v1318_v24, %v710_v23  ;;  %vm732_vm1 = vweird.f32 %v1318_v24 }
 0xaec   :  { %vm733_vm3 = vmor %vm731_vm2, %vm732_vm1 }
 0xaed   :  { %v728_v27 = vsub.f32 1.0, %v727_v25 }
 0xaef   :  { %v729_v28 = vmul.f32 %v1318_v24, %v728_v27 }
 0xaf1   :  { %v730_v29 = vadd.f32 %v1318_v24, %v729_v28  ;;  %v203_v28 = vadd.f32 %v1681_v41, %v1508_v26 }
 0xaf3   :  { %v734_v33 = vsel %vm733_vm3, %v1318_v24, %v730_v29  ;;  %v170_v29 = vadd.f32 %v1683_v42, %v1515_v30 }
 0xaf4   :  { %v739_v35 = vsel %vm736_vm4, %v738_v34, %v734_v33 }
 0xb3b   :  { %v756_v36 = vpop.permute.xlu2 %755 }
 0xb3c   :  { %v758_v37 = vmul.f32 %v756_v36, %v739_v35 }
 0xb3e   :  { %v759_v38 = vpack.c.bf16 %v758_v37, %v758_v37 }
 0xb40   :  { %1196 = vmatmul.msk.bf16.vlgmr.msrb.gmra.mxu0 %vm127_vm0, %v759_v38  ;;  %1197 = vmatmul.msk.bf16.vlgmr.msrb.gmra.mxu1 %vm127_vm0, %v759_v38 }
 0xbbd   :  { %v772_v49 = vpop.f32.mrf.mxu0  ;;  %v785_v50 = vpop.f32.mrf.mxu1 }
 0xbbe   :  { %v789_v51 = vadd.f32 %v772_v49, %v168_v47  ;;  %v790_v52 = vadd.f32 %v785_v50, %v201_v48 }
 0xbc0   :  { %1319 = vtanh.f32 %v790_v52  ;;  %v1198_v57 = vmul.f32 -1.442695, %v789_v51  ;;  %v1199_v63 = vmul.f32 -1.442695, %v790_v52 }
 0xbc2   :  { %1321 = vpow2.f32 %v1198_v57 }
 0xbc5   :  { %v774_v53 = vpop.f32.mrf.mxu0  ;;  %v787_v54 = vpop.f32.mrf.mxu1 }
 0xbc6   :  { %v1320_v55 = vpop.eup %1319 }
 0xbc7   :  { %832 = vrot.lane.b32.xlu0 %v1320_v55, %s1410_s1 }
 0xbc8   :  { %v1322_v58 = vpop.eup %1321 }
 0xbc9   :  { %v797_v59 = vadd.f32 1.0, %v1322_v58 }
 0xbcb   :  { %1323 = vrcp.f32 %v797_v59  ;;  %v810_v7 = vand.u32 2147483648, %v797_v59  ;;  %vm804_vm6 = vweird.f32 %v797_v59  ;;  %v808_v8 = vand.u32 2147483647, %v797_v59 }
 0xbcd   :  { %v811_v10 = vor.u32 1.1754944e-38, %v810_v7  ;;  %vm809_vm8 = vcmp.eq.f32.partialorder %v808_v8, 8.507059e+37 }
 0xbd1   :  { %v1324_v61 = vpop.eup %1323 }
 0xbd2   :  { %v800_v62 = vmul.f32 %v1324_v61, %v797_v59  ;;  %vm805_vm5 = vweird.f32 %v1324_v61 }
 0xbd3   :  { %vm806_vm7 = vmor %vm804_vm6, %vm805_vm5 }
 0xbd4   :  { %v801_v1 = vsub.f32 1.0, %v800_v62 }
 0xbd6   :  { %v802_v2 = vmul.f32 %v1324_v61, %v801_v1 }
 0xbd8   :  { %v803_v4 = vadd.f32 %v1324_v61, %v802_v2 }
 0xbda   :  { %v807_v3 = vsel %vm806_vm7, %v1324_v61, %v803_v4 }
 0xbdb   :  { %v812_v9 = vsel %vm809_vm8, %v811_v10, %v807_v3 }
 0xbdc   :  { %v830_v60 = vmul.f32 %v812_v9, %v1675_v18 }
 0xc39   :  { %v833_v11 = vpop.permute.xlu0 %832 }
 0xc3a   :  { %v835_v12 = vmul.f32 %v833_v11, %v812_v9 }
 0xc3c   :  { %837 = vrot.lane.b32.xlu1 %v835_v12, %s1410_s1 }
 0xcae   :  { %v838_v56 = vpop.permute.xlu1 %837 }
 0xcaf   :  { %v840_v13 = vadd.f32 %v838_v56, %v830_v60 }
 0xcb1   :  { %1325 = vtanh.f32 %v840_v13 }
 0xcb2   :  { %1327 = vpow2.f32 %v1199_v63  ;;  %v206_v63 = vadd.f32 %v1685_v43, %v1508_v26 }
 0xcb7   :  { %v1326_v0 = vpop.eup %1325 }
 0xcb8   :  { %843 = vrot.lane.b32.xlu2 %v1326_v0, %s1410_s1  ;;  %v1328_v6 = vpop.eup %1327 }
 0xcb9   :  { %v798_v5 = vadd.f32 1.0, %v1328_v6  ;;  %v173_v6 = vadd.f32 %v1687_v44, %v1515_v30 }
 0xcbb   :  { %1329 = vrcp.f32 %v798_v5  ;;  %v825_v20 = vand.u32 2147483648, %v798_v5  ;;  %vm819_vm10 = vweird.f32 %v798_v5  ;;  %v823_v18 = vand.u32 2147483647, %v798_v5 }
 0xcbd   :  { %v826_v22 = vor.u32 1.1754944e-38, %v825_v20  ;;  %vm824_vm12 = vcmp.eq.f32.partialorder %v823_v18, 8.507059e+37 }
 0xcc1   :  { %v1330_v14 = vpop.eup %1329 }
 0xcc2   :  { %v815_v19 = vmul.f32 %v1330_v14, %v798_v5  ;;  %vm820_vm9 = vweird.f32 %v1330_v14 }
 0xcc3   :  { %vm821_vm11 = vmor %vm819_vm10, %vm820_vm9 }
 0xcc4   :  { %v816_v17 = vsub.f32 1.0, %v815_v19 }
 0xcc6   :  { %v817_v15 = vmul.f32 %v1330_v14, %v816_v17 }
 0xcc8   :  { %v818_v16 = vadd.f32 %v1330_v14, %v817_v15 }
 0xcca   :  { %v822_v21 = vsel %vm821_vm11, %v1330_v14, %v818_v16 }
 0xccb   :  { %v827_v23 = vsel %vm824_vm12, %v826_v22, %v822_v21 }
 0xd12   :  { %v844_v24 = vpop.permute.xlu2 %843 }
 0xd13   :  { %v846_v25 = vmul.f32 %v844_v24, %v827_v23 }
 0xd15   :  { %v847_v27 = vpack.c.bf16 %v846_v25, %v846_v25 }
 0xd17   :  { %1200 = vmatmul.msk.bf16.vlgmr.msrb.gmra.mxu2 %vm127_vm0, %v847_v27  ;;  %1201 = vmatmul.msk.bf16.vlgmr.msrb.gmra.mxu3 %vm127_vm0, %v847_v27 }
 0xd9a   :  { %v860_v31 = vpop.f32.mrf.mxu2  ;;  %v873_v32 = vpop.f32.mrf.mxu3 }
 0xd9b   :  { %v877_v33 = vadd.f32 %v860_v31, %v170_v29  ;;  %v878_v34 = vadd.f32 %v873_v32, %v203_v28 }
 0xd9d   :  { %1331 = vtanh.f32 %v878_v34  ;;  %v1202_v38 = vmul.f32 -1.442695, %v877_v33  ;;  %v1203_v61 = vmul.f32 -1.442695, %v878_v34 }
 0xd9f   :  { %1333 = vpow2.f32 %v1202_v38 }
 0xda2   :  { %v862_v35 = vpop.f32.mrf.mxu2  ;;  %v875_v36 = vpop.f32.mrf.mxu3 }
 0xda3   :  { %v1332_v37 = vpop.eup %1331 }
 0xda4   :  { %920 = vrot.lane.b32.xlu0 %v1332_v37, %s1410_s1 }
 0xda5   :  { %v1334_v39 = vpop.eup %1333 }
 0xda6   :  { %v885_v40 = vadd.f32 1.0, %v1334_v39 }
 0xda8   :  { %1335 = vrcp.f32 %v885_v40  ;;  %v898_v48 = vand.u32 2147483648, %v885_v40  ;;  %vm892_vm14 = vweird.f32 %v885_v40  ;;  %v896_v49 = vand.u32 2147483647, %v885_v40 }
 0xdaa   :  { %v899_v51 = vor.u32 1.1754944e-38, %v898_v48  ;;  %vm897_vm1 = vcmp.eq.f32.partialorder %v896_v49, 8.507059e+37 }
 0xdae   :  { %v1336_v45 = vpop.eup %1335 }
 0xdaf   :  { %v888_v41 = vmul.f32 %v1336_v45, %v885_v40  ;;  %vm893_vm13 = vweird.f32 %v1336_v45  ;;  %v1238_v40 = vld [vmem:[%s1729_s4 + $0x8] sm:$0xff] }
 0xdb0   :  { %vm894_vm15 = vmor %vm892_vm14, %vm893_vm13  ;;  %1057 = vmatpush.bf16.msra.mxu2 %v1238_v40  ;;  %vm1047_vm13 = vcmask 261120   ;;  %vm1064_vm14 = vcmask 48128  }
 0xdb1   :  { %v889_v46 = vsub.f32 1.0, %v888_v41 }
 0xdb3   :  { %v890_v47 = vmul.f32 %v1336_v45, %v889_v46 }
 0xdb5   :  { %v891_v42 = vadd.f32 %v1336_v45, %v890_v47 }
 0xdb7   :  { %v895_v50 = vsel %vm894_vm15, %v1336_v45, %v891_v42  ;;  %v1237_v45 = vld [vmem:[%s1729_s4] sm:$0xff] }
 0xdb8   :  { %v900_v53 = vsel %vm897_vm1, %v899_v51, %v895_v50  ;;  %1058 = vmatpush.bf16.msra.mxu2 %v1237_v45 }
 0xdb9   :  { %v918_v55 = vmul.f32 %v900_v53, %v840_v13 }
 0xe16   :  { %v921_v52 = vpop.permute.xlu0 %920 }
 0xe17   :  { %v923_v54 = vmul.f32 %v921_v52, %v900_v53 }
 0xe19   :  { %925 = vrot.lane.b32.xlu1 %v923_v54, %s1410_s1 }
 0xe8b   :  { %v926_v57 = vpop.permute.xlu1 %925 }
 0xe8c   :  { %v928_v58 = vadd.f32 %v926_v57, %v918_v55 }
 0xe8e   :  { %1337 = vtanh.f32 %v928_v58 }
 0xe8f   :  { %1339 = vpow2.f32 %v1203_v61 }
 0xe94   :  { %v1338_v59 = vpop.eup %1337 }
 0xe95   :  { %931 = vrot.lane.b32.xlu2 %v1338_v59, %s1410_s1  ;;  %v1340_v62 = vpop.eup %1339  ;;  %v1246_v59 = vld [vmem:[%s1730_s5] ss:$0 sm:$0xff] }
 0xe96   :  { %v886_v1 = vadd.f32 1.0, %v1340_v62 }
 0xe98   :  { %1341 = vrcp.f32 %v886_v1  ;;  %v913_v10 = vand.u32 2147483648, %v886_v1  ;;  %vm907_vm3 = vweird.f32 %v886_v1  ;;  %v911_v11 = vand.u32 2147483647, %v886_v1 }
 0xe9a   :  { %v914_v12 = vor.u32 1.1754944e-38, %v913_v10  ;;  %vm912_vm5 = vcmp.eq.f32.partialorder %v911_v11, 8.507059e+37 }
 0xe9e   :  { %v1342_v2 = vpop.eup %1341 }
 0xe9f   :  { %v903_v4 = vmul.f32 %v1342_v2, %v886_v1  ;;  %vm908_vm2 = vweird.f32 %v1342_v2 }
 0xea0   :  { %vm909_vm4 = vmor %vm907_vm3, %vm908_vm2 }
 0xea1   :  { %v904_v7 = vsub.f32 1.0, %v903_v4 }
 0xea3   :  { %v905_v8 = vmul.f32 %v1342_v2, %v904_v7 }
 0xea5   :  { %v906_v3 = vadd.f32 %v1342_v2, %v905_v8 }
 0xea7   :  { %v910_v9 = vsel %vm909_vm4, %v1342_v2, %v906_v3 }
 0xea8   :  { %v915_v60 = vsel %vm912_vm5, %v914_v12, %v910_v9 }
 0xeef   :  { %v932_v56 = vpop.permute.xlu2 %931 }
 0xef0   :  { %v934_v13 = vmul.f32 %v932_v56, %v915_v60 }
 0xef2   :  { %v935_v0 = vpack.c.bf16 %v934_v13, %v934_v13 }
 0xef4   :  { %1204 = vmatmul.msk.bf16.vlgmr.msra.gmra.mxu0 %vm127_vm0, %v935_v0  ;;  %1205 = vmatmul.msk.bf16.vlgmr.msra.gmra.mxu1 %vm127_vm0, %v935_v0 }
 0xf71   :  { %v948_v5 = vpop.f32.mrf.mxu0  ;;  %v961_v14 = vpop.f32.mrf.mxu1 }
 0xf72   :  { %v965_v19 = vadd.f32 %v948_v5, %v173_v6  ;;  %v966_v17 = vadd.f32 %v961_v14, %v206_v63 }
 0xf74   :  { %1343 = vtanh.f32 %v966_v17  ;;  %v1206_v18 = vmul.f32 -1.442695, %v965_v19  ;;  %v1207_v37 = vmul.f32 -1.442695, %v966_v17 }
 0xf76   :  { %1345 = vpow2.f32 %v1206_v18 }
 0xf79   :  { %v950_v15 = vpop.f32.mrf.mxu0  ;;  %v963_v16 = vpop.f32.mrf.mxu1 }
 0xf7a   :  { %v1344_v20 = vpop.eup %1343 }
 0xf7b   :  { %1008 = vrot.lane.b32.xlu0 %v1344_v20, %s1410_s1 }
 0xf7c   :  { %v1346_v21 = vpop.eup %1345 }
 0xf7d   :  { %v973_v22 = vadd.f32 1.0, %v1346_v21 }
 0xf7f   :  { %1347 = vrcp.f32 %v973_v22  ;;  %v986_v44 = vand.u32 2147483648, %v973_v22  ;;  %vm980_vm6 = vweird.f32 %v973_v22  ;;  %v984_v25 = vand.u32 2147483647, %v973_v22 }
 0xf81   :  { %v987_v28 = vor.u32 1.1754944e-38, %v986_v44  ;;  %vm985_vm8 = vcmp.eq.f32.partialorder %v984_v25, 8.507059e+37 }
 0xf85   :  { %v1348_v23 = vpop.eup %1347 }
 0xf86   :  { %v976_v26 = vmul.f32 %v1348_v23, %v973_v22  ;;  %vm981_vm0 = vweird.f32 %v1348_v23 }
 0xf87   :  { %vm982_vm7 = vmor %vm980_vm6, %vm981_vm0 }
 0xf88   :  { %v977_v43 = vsub.f32 1.0, %v976_v26 }
 0xf8a   :  { %v978_v24 = vmul.f32 %v1348_v23, %v977_v43 }
 0xf8c   :  { %v979_v30 = vadd.f32 %v1348_v23, %v978_v24 }
 0xf8e   :  { %v983_v27 = vsel %vm982_vm7, %v1348_v23, %v979_v30 }
 0xf8f   :  { %v988_v31 = vsel %vm985_vm8, %v987_v28, %v983_v27 }
 0xf90   :  { %v1006_v33 = vmul.f32 %v988_v31, %v928_v58 }
 0xfed   :  { %v1009_v29 = vpop.permute.xlu0 %1008 }
 0xfee   :  { %v1011_v32 = vmul.f32 %v1009_v29, %v988_v31 }
 0xff0   :  { %1013 = vrot.lane.b32.xlu1 %v1011_v32, %s1410_s1 }
0x1062   :  { %v1014_v34 = vpop.permute.xlu1 %1013 }
0x1063   :  { %v1016_v35 = vadd.f32 %v1014_v34, %v1006_v33 }
0x1065   :  { %1349 = vtanh.f32 %v1016_v35 }
0x1066   :  { %1351 = vpow2.f32 %v1207_v37 }
0x106b   :  { %v1350_v36 = vpop.eup %1349 }
0x106c   :  { %1019 = vrot.lane.b32.xlu2 %v1350_v36, %s1410_s1  ;;  %v1352_v38 = vpop.eup %1351 }
0x106d   :  { %v974_v39 = vadd.f32 1.0, %v1352_v38 }
0x106f   :  { %1353 = vrcp.f32 %v974_v39  ;;  %v1001_v49 = vand.u32 2147483648, %v974_v39  ;;  %vm995_vm10 = vweird.f32 %v974_v39  ;;  %v999_v50 = vand.u32 2147483647, %v974_v39 }
0x1071   :  { %v1002_v52 = vor.u32 1.1754944e-38, %v1001_v49  ;;  %vm1000_vm12 = vcmp.eq.f32.partialorder %v999_v50, 8.507059e+37 }
0x1075   :  { %v1354_v41 = vpop.eup %1353 }
0x1076   :  { %v991_v46 = vmul.f32 %v1354_v41, %v974_v39  ;;  %vm996_vm9 = vweird.f32 %v1354_v41 }
0x1077   :  { %vm997_vm11 = vmor %vm995_vm10, %vm996_vm9 }
0x1078   :  { %v992_v47 = vsub.f32 1.0, %v991_v46 }
0x107a   :  { %v993_v42 = vmul.f32 %v1354_v41, %v992_v47 }
0x107c   :  { %v994_v48 = vadd.f32 %v1354_v41, %v993_v42 }
0x107e   :  { %v998_v51 = vsel %vm997_vm11, %v1354_v41, %v994_v48 }
0x107f   :  { %v1003_v53 = vsel %vm1000_vm12, %v1002_v52, %v998_v51 }
0x10c6   :  { %v1020_v54 = vpop.permute.xlu2 %1019 }
0x10c7   :  { %v1022_v55 = vmul.f32 %v1020_v54, %v1003_v53 }
0x10c9   :  { %v1023_v57 = vpack.c.bf16 %v1022_v55, %v1022_v55 }
0x10cb   :  { %1033 = vrot.lane.b32.xlu0 %v1023_v57, %s1412_s24 }
0x113d   :  { %v1034_v58 = vpop.permute.xlu0 %1033 }
0x113e   :  { %1216 = vmatmul.msk.bf16.vlgmr.msra.gmra.mxu2 %vm1047_vm13, %v1034_v58 }
0x11c1   :  { %v1060_v61 = vpop.f32.mrf.mxu2 }
0x11c2   :  { %v1061_v62 = vadd.f32 %v1246_v59, %v1060_v61 }
0x11c4   :  { %1065 = vst.msk [vmem:[#allocation5] sm:$0xff] %vm1064_vm14, %v1061_v62 }
0x11c5   :  { %1076 = dma.vmem_to_hbm [thread:$0]  %s1072_s27, 128, %s1074_s30, [#allocation4]  }
0x11c9   :  { %v1062_v1 = vpop.f32.mrf.mxu2 }
0x11ca   :  { %1405 = dma.done.wait [#allocation4], 128  }
0x11cb   :  { %1406 = vsyncadd [#allocation4], 4294967168 }
0x11cc   :  { %1081 = vsyncpa [#allocation3], 1 }
0x11cd   :  { %1082 = vsyncpa [#allocation4], 1 }

</bundles_post_ra>
